<compile_context>
chip_gen: v5e
topology: v5e:2x2
jax: 0.10.0
libtpu: 0.0.40
codegen_flags: <defaults>
</compile_context>

<pallas_src>
import functools
import math

import jax
import jax.numpy as jnp
from jax import lax
from jax.experimental import pallas as pl
from jax.experimental.pallas import tpu as pltpu


_NEG_INF = -1e9
_LN_EPS = 1e-5


# ----------------------------------------------------------------------------
# Generation-aware VMEM / tiling policy
# ----------------------------------------------------------------------------
def _device_kind():
    try:
        return jax.devices()[0].device_kind.lower()
    except Exception:
        return ""


_KIND = _device_kind()
_IS_V7 = "v7" in _KIND
_IS_BIG_VMEM = any(t in _KIND for t in ("v5 lite", "v5e", "v6"))  # 128 MiB VMEM

if _IS_V7:
    _VMEM_LIMIT = 52 * 1024 * 1024     # 64 MiB physical on v7x
    _ROW_TILE_CAP = 512                # O-proj / LN row tiles
    _FFN_TILE_CAP = 256                # FFN keeps a (tm, d_ff) intermediate live
elif _IS_BIG_VMEM:
    _VMEM_LIMIT = 96 * 1024 * 1024     # 128 MiB physical on v5e / v6e
    _ROW_TILE_CAP = 1024
    _FFN_TILE_CAP = 512
else:                                   # conservative default for other chips
    _VMEM_LIMIT = 64 * 1024 * 1024
    _ROW_TILE_CAP = 512
    _FFN_TILE_CAP = 256


def _cparams(n_parallel_axes=1):
    return pltpu.CompilerParams(
        dimension_semantics=("parallel",) * n_parallel_axes,
        vmem_limit_bytes=_VMEM_LIMIT,
    )


def _tile(n, cap):
    return n if n <= cap else cap


def _resident(block_shape):
    """BlockSpec for a grid-invariant operand (weight/bias): one VMEM buffer."""
    idx = lambda *args: (0,) * len(block_shape)
    try:
        return pl.BlockSpec(block_shape, idx, pipeline_mode=pl.Buffered(1))
    except TypeError:  # older jax without BlockSpec.pipeline_mode
        return pl.BlockSpec(block_shape, idx)


# ----------------------------------------------------------------------------
# Attention kernels: fused per-head projection + softmax(QK^T)V
# grid = (batch, head); weights are head-major so head selection is done by
# the BlockSpec index_map (no in-kernel lane slicing, no concat).
# ----------------------------------------------------------------------------
def _attention_math(q, k, v, bias):
    # q:(Sq,dk) k,v:(Sk,dk) f32; bias: additive mask broadcastable to (Sq,Sk).
    s = lax.dot_general(                      # q @ k^T without an XLU transpose
        q.astype(jnp.bfloat16), k.astype(jnp.bfloat16),
        (((1,), (1,)), ((), ())),
        preferred_element_type=jnp.float32,
    )
    s = s + bias
    s = s - jnp.max(s, axis=-1, keepdims=True)
    p = jnp.exp(s)
    denom = jnp.sum(p, axis=-1, keepdims=True)
    o = jnp.dot(p.astype(jnp.bfloat16), v.astype(jnp.bfloat16),
                preferred_element_type=jnp.float32)
    return o * pl.reciprocal(denom, approx=True)


def _self_attn_kernel(x_ref, wq_ref, bq_ref, wk_ref, bk_ref, wv_ref, bv_ref,
                      pad_ref, o_ref):
    x = x_ref[0].astype(jnp.bfloat16)                      # (S, D)
    # Per-head projections (scale 1/sqrt(dk) folded into wq/bq at init).
    q = jnp.dot(x, wq_ref[0], preferred_element_type=jnp.float32) + bq_ref[0]
    k = jnp.dot(x, wk_ref[0], preferred_element_type=jnp.float32) + bk_ref[0]
    v = jnp.dot(x, wv_ref[0], preferred_element_type=jnp.float32) + bv_ref[0]
    S = x.shape[0]
    # Causal mask rebuilt in-kernel; only a (1, S) pad vector comes from HBM.
    row = lax.broadcasted_iota(jnp.int32, (S, S), 0)
    col = lax.broadcasted_iota(jnp.int32, (S, S), 1)
    keep = jnp.logical_and(row >= col, pad_ref[0] > 0.5)   # (S, S)
    bias = jnp.where(keep, 0.0, _NEG_INF)
    o_ref[0, 0] = _attention_math(q, k, v, bias).astype(o_ref.dtype)


def _cross_attn_kernel(xq_ref, mem_ref, wq_ref, bq_ref, wk_ref, bk_ref,
                       wv_ref, bv_ref, pad_ref, o_ref):
    xq = xq_ref[0].astype(jnp.bfloat16)                    # (Sq, D)
    mem = mem_ref[0].astype(jnp.bfloat16)                  # (Sk, D)
    q = jnp.dot(xq, wq_ref[0], preferred_element_type=jnp.float32) + bq_ref[0]
    k = jnp.dot(mem, wk_ref[0], preferred_element_type=jnp.float32) + bk_ref[0]
    v = jnp.dot(mem, wv_ref[0], preferred_element_type=jnp.float32) + bv_ref[0]
    bias = jnp.where(pad_ref[0] > 0.5, 0.0, _NEG_INF)      # (1, Sk)
    o_ref[0, 0] = _attention_math(q, k, v, bias).astype(o_ref.dtype)


def self_attention(x, pad, p):
    B, S, D = x.shape
    H, _, d_k = p["wq"].shape
    head_w = pl.BlockSpec((1, D, d_k), lambda b, h: (h, 0, 0))
    head_b = pl.BlockSpec((1, 1, d_k), lambda b, h: (h, 0, 0))
    return pl.pallas_call(
        _self_attn_kernel,
        out_shape=jax.ShapeDtypeStruct((B, H, S, d_k), jnp.bfloat16),
        grid=(B, H),
        in_specs=[
            pl.BlockSpec((1, S, D), lambda b, h: (b, 0, 0)),   # x (const over h)
            head_w, head_b, head_w, head_b, head_w, head_b,
            pl.BlockSpec((1, 1, S), lambda b, h: (b, 0, 0)),   # pad vector
        ],
        out_specs=pl.BlockSpec((1, 1, S, d_k), lambda b, h: (b, h, 0, 0)),
        compiler_params=_cparams(2),
    )(x, p["wq"], p["bq"], p["wk"], p["bk"], p["wv"], p["bv"], pad)


def cross_attention(xq, mem, pad, p):
    B, Sq, D = xq.shape
    Sk = mem.shape[1]
    H, _, d_k = p["wq"].shape
    head_w = pl.BlockSpec((1, D, d_k), lambda b, h: (h, 0, 0))
    head_b = pl.BlockSpec((1, 1, d_k), lambda b, h: (h, 0, 0))
    return pl.pallas_call(
        _cross_attn_kernel,
        out_shape=jax.ShapeDtypeStruct((B, H, Sq, d_k), jnp.bfloat16),
        grid=(B, H),
        in_specs=[
            pl.BlockSpec((1, Sq, D), lambda b, h: (b, 0, 0)),  # decoder stream
            pl.BlockSpec((1, Sk, D), lambda b, h: (b, 0, 0)),  # encoder memory
            head_w, head_b, head_w, head_b, head_w, head_b,
            pl.BlockSpec((1, 1, Sk), lambda b, h: (b, 0, 0)),
        ],
        out_specs=pl.BlockSpec((1, 1, Sq, d_k), lambda b, h: (b, h, 0, 0)),
        compiler_params=_cparams(2),
    )(xq, mem, p["wq"], p["bq"], p["wk"], p["bk"], p["wv"], p["bv"], pad)


# ----------------------------------------------------------------------------
# Fused O-projection (head merge folded into per-head Wo) + residual + LayerNorm
# ----------------------------------------------------------------------------
def _oproj_add_ln_kernel(attn_ref, r_ref, wo_ref, bo_ref, g_ref, b_ref, o_ref,
                         *, n_heads):
    # concat(heads) @ Wo  ==  sum_h attn_h @ Wo[h]   (Wo stored as (H, dk, D))
    acc = jnp.dot(attn_ref[0, 0], wo_ref[0], preferred_element_type=jnp.float32)
    for h in range(1, n_heads):
        acc = acc + jnp.dot(attn_ref[0, h], wo_ref[h],
                            preferred_element_type=jnp.float32)
    z = r_ref[0] + acc + bo_ref[...]
    mean = jnp.mean(z, axis=-1, keepdims=True)
    var = jnp.mean((z - mean) ** 2, axis=-1, keepdims=True)
    o_ref[0] = (z - mean) * lax.rsqrt(var + _LN_EPS) * g_ref[...] + b_ref[...]


def oproj_add_ln(attn, resid, wo, bo, gamma, beta):
    B, H, S, d_k = attn.shape
    D = resid.shape[-1]
    ts = _tile(S, _ROW_TILE_CAP)
    kern = functools.partial(_oproj_add_ln_kernel, n_heads=H)
    return pl.pallas_call(
        kern,
        out_shape=jax.ShapeDtypeStruct((B, S, D), jnp.float32),
        grid=(B, pl.cdiv(S, ts)),
        in_specs=[
            pl.BlockSpec((1, H, ts, d_k), lambda b, s: (b, 0, s, 0)),  # bf16 attn
            pl.BlockSpec((1, ts, D), lambda b, s: (b, s, 0)),          # f32 resid
            _resident((H, d_k, D)),
            _resident((1, D)),
            _resident((1, D)),
            _resident((1, D)),
        ],
        out_specs=pl.BlockSpec((1, ts, D), lambda b, s: (b, s, 0)),
        compiler_params=_cparams(2),
    )(attn, resid, wo, bo, gamma, beta)


# ----------------------------------------------------------------------------
# Fused position-wise FFN + residual add + LayerNorm (row-tiled over B*S)
# ----------------------------------------------------------------------------
def _ffn_add_ln_kernel(x_ref, w1_ref, b1_ref, w2_ref, b2_ref, g_ref, b_ref, o_ref):
    x = x_ref[...]
    h = (jnp.dot(x.astype(jnp.bfloat16), w1_ref[...],
                 preferred_element_type=jnp.float32) + b1_ref[...])
    h = jnp.maximum(h, 0.0).astype(jnp.bfloat16)   # single bf16 binding stays live
    y = (jnp.dot(h, w2_ref[...], preferred_element_type=jnp.float32)
         + b2_ref[...])
    z = x + y
    mean = jnp.mean(z, axis=-1, keepdims=True)
    var = jnp.mean((z - mean) ** 2, axis=-1, keepdims=True)
    o_ref[...] = (z - mean) * lax.rsqrt(var + _LN_EPS) * g_ref[...] + b_ref[...]


def ffn_add_ln(x2d, w1, b1, w2, b2, gamma, beta):
    M, D = x2d.shape
    d_ff = w1.shape[1]
    tm = _tile(M, _FFN_TILE_CAP)
    return pl.pallas_call(
        _ffn_add_ln_kernel,
        out_shape=jax.ShapeDtypeStruct((M, D), jnp.float32),
        grid=(pl.cdiv(M, tm),),
        in_specs=[
            pl.BlockSpec((tm, D), lambda i: (i, 0)),
            _resident((D, d_ff)),
            _resident((1, d_ff)),
            _resident((d_ff, D)),
            _resident((1, D)),
            _resident((1, D)),
            _resident((1, D)),
        ],
        out_specs=pl.BlockSpec((tm, D), lambda i: (i, 0)),
        compiler_params=_cparams(1),
    )(x2d, w1, b1, w2, b2, gamma, beta)


# ----------------------------------------------------------------------------
# Model glue (plain JAX)
# ----------------------------------------------------------------------------
def positional_encoding(d_model, max_len):
    pos = jnp.arange(max_len, dtype=jnp.float32)[:, None]
    even = jnp.arange(0, d_model, 2, dtype=jnp.float32)
    div_term = jnp.power(10000.0, even / d_model)
    pe_sin = jnp.sin(pos / div_term)
    pe_cos = jnp.cos(pos / div_term)
    return jnp.stack([pe_sin, pe_cos], axis=-1).reshape(max_len, d_model)


def decoder_layer(x, memory, self_pad, cross_pad, p):
    B, S, D = x.shape
    sa, ca = p["self_attn"], p["cross_attn"]

    # ---- masked self-attention (QKV projection fused into the kernel) ----
    attn = self_attention(x, self_pad, sa)                       # (B,H,S,dk) bf16
    x = oproj_add_ln(attn, x, sa["wo"], sa["bo"], p["ln1_g"], p["ln1_b"])

    # ---- cross-attention (Q / K / V projections fused into the kernel) ----
    attn = cross_attention(x, memory, cross_pad, ca)             # (B,H,S,dk) bf16
    x = oproj_add_ln(attn, x, ca["wo"], ca["bo"], p["ln2_g"], p["ln2_b"])

    # ---- position-wise FFN + residual + LayerNorm (single fused kernel) ----
    x2d = ffn_add_ln(x.reshape(B * S, D), p["w1"], p["b1"], p["w2"], p["b2"],
                     p["ln3_g"], p["ln3_b"])
    return x2d.reshape(B, S, D)


def decoder_forward(params, x_ids, memory, look_ahead_mask, padding_mask):
    # Embedding lookup (gather) + positional encoding (plain JAX glue).
    emb = jnp.take(params["emb"], x_ids, axis=0)                 # (B, S, D)
    S = x_ids.shape[1]
    x = emb + params["pe"][:S][None, :, :]
    # dropout: identity (eval mode)

    # Compact per-key padding vectors (causal part is rebuilt in-kernel).
    self_pad = look_ahead_mask[:, 0, -1:, :].astype(jnp.float32)   # (B, 1, S_tgt)
    cross_pad = padding_mask[:, 0, -1:, :].astype(jnp.float32)     # (B, 1, S_src)

    for lp in params["layers"]:
        x = decoder_layer(x, memory, self_pad, cross_pad, lp)
    return x


# ----------------------------------------------------------------------------
# Deterministic parameter init (head-major bf16 weights, scale folded into Wq)
# ----------------------------------------------------------------------------
def _init_linear(key, d_in, d_out):
    w = jax.random.normal(key, (d_in, d_out), jnp.float32) * (1.0 / math.sqrt(d_in))
    b = jnp.zeros((1, d_out), jnp.float32)
    return w.astype(jnp.bfloat16), b


def _init_mha(key, d_model, head):
    d_k = d_model // head
    kq, kk, kv, ko = jax.random.split(key, 4)

    def lin(k):
        w = jax.random.normal(k, (d_model, d_model), jnp.float32) / math.sqrt(d_model)
        b = jnp.zeros((d_model,), jnp.float32)
        return w, b

    wq, bq = lin(kq)
    wk, bk = lin(kk)
    wv, bv = lin(kv)
    wo, bo = lin(ko)

    # Fold the 1/sqrt(d_k) attention scale into the query projection (free).
    scale = 1.0 / math.sqrt(d_k)
    wq, bq = wq * scale, bq * scale

    def head_major(w, b):
        # (D, D) -> (H, D, dk) weight, (D,) -> (H, 1, dk) bias
        wh = w.reshape(d_model, head, d_k).transpose(1, 0, 2)
        bh = b.reshape(head, 1, d_k)
        return wh.astype(jnp.bfloat16), bh

    wqh, bqh = head_major(wq, bq)
    wkh, bkh = head_major(wk, bk)
    wvh, bvh = head_major(wv, bv)
    # O-projection stored per head: (D, D) -> (H, dk, D); merge is a sum over h.
    woh = wo.reshape(head, d_k, d_model).astype(jnp.bfloat16)
    boh = bo.reshape(1, d_model)
    return dict(wq=wqh, bq=bqh, wk=wkh, bk=bkh, wv=wvh, bv=bvh, wo=woh, bo=boh)


def init_params(key, n_vocab, d_model, head, d_ff, max_len, padding_idx, n_layers):
    keys = jax.random.split(key, 1 + n_layers)
    emb = jax.random.normal(keys[0], (n_vocab, d_model), jnp.float32) * 0.02
    emb = emb.at[padding_idx].set(0.0)  # padding_idx row zeroed (nn.Embedding)
    layers = []
    for i in range(n_layers):
        lk = jax.random.split(keys[1 + i], 4)
        w1, b1 = _init_linear(lk[2], d_model, d_ff)
        w2, b2 = _init_linear(lk[3], d_ff, d_model)
        layers.append(
            dict(
                self_attn=_init_mha(lk[0], d_model, head),
                cross_attn=_init_mha(lk[1], d_model, head),
                w1=w1, b1=b1, w2=w2, b2=b2,
                ln1_g=jnp.ones((1, d_model), jnp.float32),
                ln1_b=jnp.zeros((1, d_model), jnp.float32),
                ln2_g=jnp.ones((1, d_model), jnp.float32),
                ln2_b=jnp.zeros((1, d_model), jnp.float32),
                ln3_g=jnp.ones((1, d_model), jnp.float32),
                ln3_b=jnp.zeros((1, d_model), jnp.float32),
            )
        )
    return dict(emb=emb, pe=positional_encoding(d_model, max_len), layers=layers)


# ----------------------------------------------------------------------------
# Demo
# ----------------------------------------------------------------------------
if __name__ == "__main__":
    n_output_vocab = 50
    d_model = 32
    head = 4
    d_ff = 64
    max_len = 16
    padding_idx = 0
    n_layers = 2

    B, S_tgt, S_src = 2, 8, 12

    key = jax.random.PRNGKey(0)
    kp, kx, km = jax.random.split(key, 3)

    params = init_params(kp, n_output_vocab, d_model, head, d_ff,
                         max_len, padding_idx, n_layers)

    # Target token ids (avoid padding_idx=0 except one deliberate pad).
    x_ids = jax.random.randint(kx, (B, S_tgt), 1, n_output_vocab).astype(jnp.int32)
    x_ids = x_ids.at[1, -1].set(padding_idx)

    # Encoder memory.
    memory = jax.random.normal(km, (B, S_src, d_model), jnp.float32)

    # Masks: value 0 => masked position.
    look_ahead_mask = jnp.tril(jnp.ones((S_tgt, S_tgt), jnp.float32))[None, None]
    look_ahead_mask = jnp.broadcast_to(look_ahead_mask, (B, 1, S_tgt, S_tgt))
    padding_mask = jnp.ones((B, 1, 1, S_src), jnp.float32)
    padding_mask = padding_mask.at[1, 0, 0, -2:].set(0.0)

    fwd = jax.jit(decoder_forward)
    out = fwd(params, x_ids, memory, look_ahead_mask, padding_mask)
    out = jax.block_until_ready(out)
    assert out.shape == (B, S_tgt, d_model)
    print("KERNEL_OK")
</pallas_src>

<mosaic_0001>
module attributes {stable_mosaic.version = 11 : i64} {
  func.func @_self_attn_kernel(%arg0: i32, %arg1: i32, %arg2: memref<1x8x32xf32, #tpu.memory_space<vmem>>, %arg3: memref<1x32x8xbf16, #tpu.memory_space<vmem>>, %arg4: memref<1x1x8xf32, #tpu.memory_space<vmem>>, %arg5: memref<1x32x8xbf16, #tpu.memory_space<vmem>>, %arg6: memref<1x1x8xf32, #tpu.memory_space<vmem>>, %arg7: memref<1x32x8xbf16, #tpu.memory_space<vmem>>, %arg8: memref<1x1x8xf32, #tpu.memory_space<vmem>>, %arg9: memref<1x1x8xf32, #tpu.memory_space<vmem>>, %arg10: memref<1x1x8x8xbf16, #tpu.memory_space<vmem>>) attributes {dimension_semantics = [#tpu.dimension_semantics<parallel>, #tpu.dimension_semantics<parallel>], iteration_bounds = array<i64: 2, 4>, scalar_prefetch = 0 : i64, scratch_operands = 0 : i64, tpu.core_type = #tpu.core_type<tc>, window_params = [{transform_indices = @transform_0, window_bounds = array<i64: 1, 8, 32>}, {transform_indices = @transform_1, window_bounds = array<i64: 1, 32, 8>}, {transform_indices = @transform_2, window_bounds = array<i64: 1, 1, 8>}, {transform_indices = @transform_3, window_bounds = array<i64: 1, 32, 8>}, {transform_indices = @transform_4, window_bounds = array<i64: 1, 1, 8>}, {transform_indices = @transform_5, window_bounds = array<i64: 1, 32, 8>}, {transform_indices = @transform_6, window_bounds = array<i64: 1, 1, 8>}, {transform_indices = @transform_7, window_bounds = array<i64: 1, 1, 8>}, {transform_indices = @transform_8, window_bounds = array<i64: 1, 1, 8, 8>}]} {
    %c0 = arith.constant 0 : index
    %c0_0 = arith.constant 0 : index
    %c0_1 = arith.constant 0 : index
    %0 = vector.load %arg2[%c0, %c0_0, %c0_1] : memref<1x8x32xf32, #tpu.memory_space<vmem>>, vector<1x8x32xf32>
    %1 = vector.shape_cast %0 : vector<1x8x32xf32> to vector<8x32xf32>
    %2 = arith.truncf %1 : vector<8x32xf32> to vector<8x32xbf16>
    %c0_2 = arith.constant 0 : index
    %c0_3 = arith.constant 0 : index
    %c0_4 = arith.constant 0 : index
    %3 = vector.load %arg3[%c0_2, %c0_3, %c0_4] : memref<1x32x8xbf16, #tpu.memory_space<vmem>>, vector<1x32x8xbf16>
    %4 = vector.shape_cast %3 : vector<1x32x8xbf16> to vector<32x8xbf16>
    %cst = arith.constant dense<0.000000e+00> : vector<8x8xf32>
    %5 = tpu.matmul %2, %4, %cst {dimension_numbers = #tpu.dot_dimension_numbers<[1], [0], [0], [1], [0, 0, 1, 1], [], []>} : vector<8x32xbf16>, vector<32x8xbf16>, vector<8x8xf32> -> vector<8x8xf32>
    %c0_5 = arith.constant 0 : index
    %c0_6 = arith.constant 0 : index
    %c0_7 = arith.constant 0 : index
    %6 = vector.load %arg4[%c0_5, %c0_6, %c0_7] : memref<1x1x8xf32, #tpu.memory_space<vmem>>, vector<1x1x8xf32>
    %7 = vector.shape_cast %6 : vector<1x1x8xf32> to vector<1x8xf32>
    %8 = vector.broadcast %7 : vector<1x8xf32> to vector<8x8xf32>
    %9 = arith.addf %5, %8 : vector<8x8xf32>
    %c0_8 = arith.constant 0 : index
    %c0_9 = arith.constant 0 : index
    %c0_10 = arith.constant 0 : index
    %10 = vector.load %arg5[%c0_8, %c0_9, %c0_10] : memref<1x32x8xbf16, #tpu.memory_space<vmem>>, vector<1x32x8xbf16>
    %11 = vector.shape_cast %10 : vector<1x32x8xbf16> to vector<32x8xbf16>
    %cst_11 = arith.constant dense<0.000000e+00> : vector<8x8xf32>
    %12 = tpu.matmul %2, %11, %cst_11 {dimension_numbers = #tpu.dot_dimension_numbers<[1], [0], [0], [1], [0, 0, 1, 1], [], []>} : vector<8x32xbf16>, vector<32x8xbf16>, vector<8x8xf32> -> vector<8x8xf32>
    %c0_12 = arith.constant 0 : index
    %c0_13 = arith.constant 0 : index
    %c0_14 = arith.constant 0 : index
    %13 = vector.load %arg6[%c0_12, %c0_13, %c0_14] : memref<1x1x8xf32, #tpu.memory_space<vmem>>, vector<1x1x8xf32>
    %14 = vector.shape_cast %13 : vector<1x1x8xf32> to vector<1x8xf32>
    %15 = vector.broadcast %14 : vector<1x8xf32> to vector<8x8xf32>
    %16 = arith.addf %12, %15 : vector<8x8xf32>
    %c0_15 = arith.constant 0 : index
    %c0_16 = arith.constant 0 : index
    %c0_17 = arith.constant 0 : index
    %17 = vector.load %arg7[%c0_15, %c0_16, %c0_17] : memref<1x32x8xbf16, #tpu.memory_space<vmem>>, vector<1x32x8xbf16>
    %18 = vector.shape_cast %17 : vector<1x32x8xbf16> to vector<32x8xbf16>
    %cst_18 = arith.constant dense<0.000000e+00> : vector<8x8xf32>
    %19 = tpu.matmul %2, %18, %cst_18 {dimension_numbers = #tpu.dot_dimension_numbers<[1], [0], [0], [1], [0, 0, 1, 1], [], []>} : vector<8x32xbf16>, vector<32x8xbf16>, vector<8x8xf32> -> vector<8x8xf32>
    %c0_19 = arith.constant 0 : index
    %c0_20 = arith.constant 0 : index
    %c0_21 = arith.constant 0 : index
    %20 = vector.load %arg8[%c0_19, %c0_20, %c0_21] : memref<1x1x8xf32, #tpu.memory_space<vmem>>, vector<1x1x8xf32>
    %21 = vector.shape_cast %20 : vector<1x1x8xf32> to vector<1x8xf32>
    %22 = vector.broadcast %21 : vector<1x8xf32> to vector<8x8xf32>
    %23 = arith.addf %19, %22 : vector<8x8xf32>
    %24 = tpu.iota {dimensions = array<i32: 0>} : vector<8x8xi32>
    %25 = tpu.iota {dimensions = array<i32: 1>} : vector<8x8xi32>
    %26 = arith.cmpi sge, %24, %25 : vector<8x8xi32>
    %c0_22 = arith.constant 0 : index
    %c0_23 = arith.constant 0 : index
    %c0_24 = arith.constant 0 : index
    %27 = vector.load %arg9[%c0_22, %c0_23, %c0_24] : memref<1x1x8xf32, #tpu.memory_space<vmem>>, vector<1x1x8xf32>
    %28 = vector.shape_cast %27 : vector<1x1x8xf32> to vector<1x8xf32>
    %cst_25 = arith.constant 5.000000e-01 : f32
    %29 = vector.broadcast %cst_25 : f32 to vector<1x8xf32>
    %30 = arith.cmpf ogt, %28, %29 : vector<1x8xf32>
    %31 = vector.broadcast %30 : vector<1x8xi1> to vector<8x8xi1>
    %32 = arith.andi %26, %31 : vector<8x8xi1>
    %cst_26 = arith.constant 0.000000e+00 : f32
    %cst_27 = arith.constant -1.000000e+09 : f32
    %33 = vector.broadcast %cst_26 : f32 to vector<8x8xf32>
    %34 = vector.broadcast %cst_27 : f32 to vector<8x8xf32>
    %35 = arith.select %32, %33, %34 : vector<8x8xi1>, vector<8x8xf32>
    %36 = arith.truncf %9 : vector<8x8xf32> to vector<8x8xbf16>
    %37 = arith.truncf %16 : vector<8x8xf32> to vector<8x8xbf16>
    %cst_28 = arith.constant dense<0.000000e+00> : vector<8x8xf32>
    %38 = tpu.matmul %36, %37, %cst_28 {dimension_numbers = #tpu.dot_dimension_numbers<[1], [1], [0], [0], [0, 0, 1, 0], [], []>} : vector<8x8xbf16>, vector<8x8xbf16>, vector<8x8xf32> -> vector<8x8xf32>
    %39 = arith.addf %38, %35 : vector<8x8xf32>
    %cst_29 = arith.constant dense<0xFF800000> : vector<8xf32>
    %40 = vector.multi_reduction <maximumf>, %39, %cst_29 [1] : vector<8x8xf32> to vector<8xf32>
    %41 = vector.shape_cast %40 : vector<8xf32> to vector<8x1xf32>
    %42 = vector.broadcast %41 : vector<8x1xf32> to vector<8x8xf32>
    %43 = arith.subf %39, %42 : vector<8x8xf32>
    %44 = math.exp %43 : vector<8x8xf32>
    %cst_30 = arith.constant dense<0.000000e+00> : vector<8xf32>
    %45 = vector.multi_reduction <add>, %44, %cst_30 [1] : vector<8x8xf32> to vector<8xf32>
    %46 = vector.shape_cast %45 : vector<8xf32> to vector<8x1xf32>
    %47 = arith.truncf %44 : vector<8x8xf32> to vector<8x8xbf16>
    %48 = arith.truncf %23 : vector<8x8xf32> to vector<8x8xbf16>
    %cst_31 = arith.constant dense<0.000000e+00> : vector<8x8xf32>
    %49 = tpu.matmul %47, %48, %cst_31 {dimension_numbers = #tpu.dot_dimension_numbers<[1], [0], [0], [1], [0, 0, 1, 1], [], []>} : vector<8x8xbf16>, vector<8x8xbf16>, vector<8x8xf32> -> vector<8x8xf32>
    %50 = tpu.reciprocal %46 {approx = true} : vector<8x1xf32> -> vector<8x1xf32>
    %51 = vector.broadcast %50 : vector<8x1xf32> to vector<8x8xf32>
    %52 = arith.mulf %49, %51 : vector<8x8xf32>
    %53 = arith.truncf %52 : vector<8x8xf32> to vector<8x8xbf16>
    %c0_32 = arith.constant 0 : index
    %c0_33 = arith.constant 0 : index
    %c0_34 = arith.constant 0 : index
    %c0_35 = arith.constant 0 : index
    %54 = vector.load %arg10[%c0_32, %c0_33, %c0_34, %c0_35] : memref<1x1x8x8xbf16, #tpu.memory_space<vmem>>, vector<1x1x8x8xbf16>
    %55 = vector.shape_cast %54 : vector<1x1x8x8xbf16> to vector<8x8xbf16>
    %56 = vector.shape_cast %53 : vector<8x8xbf16> to vector<1x1x8x8xbf16>
    tpu.vector_store %arg10[%c0_32, %c0_33, %c0_34, %c0_35], %56 {strides = array<i32>} : memref<1x1x8x8xbf16, #tpu.memory_space<vmem>>, vector<1x1x8x8xbf16>,
    return
  }
  func.func @transform_0(%arg0: i32, %arg1: i32) -> (i32, i32, i32) {
    %c0_i32 = arith.constant 0 : i32
    %c0_i32_0 = arith.constant 0 : i32
    %c0_i32_1 = arith.constant 0 : i32
    return %arg0, %c0_i32, %c0_i32_0 : i32, i32, i32
  }
  func.func @transform_1(%arg0: i32, %arg1: i32) -> (i32, i32, i32) {
    %c0_i32 = arith.constant 0 : i32
    %c0_i32_0 = arith.constant 0 : i32
    %c0_i32_1 = arith.constant 0 : i32
    return %arg1, %c0_i32, %c0_i32_0 : i32, i32, i32
  }
  func.func @transform_2(%arg0: i32, %arg1: i32) -> (i32, i32, i32) {
    %c0_i32 = arith.constant 0 : i32
    %c0_i32_0 = arith.constant 0 : i32
    %c0_i32_1 = arith.constant 0 : i32
    return %arg1, %c0_i32, %c0_i32_0 : i32, i32, i32
  }
  func.func @transform_3(%arg0: i32, %arg1: i32) -> (i32, i32, i32) {
    %c0_i32 = arith.constant 0 : i32
    %c0_i32_0 = arith.constant 0 : i32
    %c0_i32_1 = arith.constant 0 : i32
    return %arg1, %c0_i32, %c0_i32_0 : i32, i32, i32
  }
  func.func @transform_4(%arg0: i32, %arg1: i32) -> (i32, i32, i32) {
    %c0_i32 = arith.constant 0 : i32
    %c0_i32_0 = arith.constant 0 : i32
    %c0_i32_1 = arith.constant 0 : i32
    return %arg1, %c0_i32, %c0_i32_0 : i32, i32, i32
  }
  func.func @transform_5(%arg0: i32, %arg1: i32) -> (i32, i32, i32) {
    %c0_i32 = arith.constant 0 : i32
    %c0_i32_0 = arith.constant 0 : i32
    %c0_i32_1 = arith.constant 0 : i32
    return %arg1, %c0_i32, %c0_i32_0 : i32, i32, i32
  }
  func.func @transform_6(%arg0: i32, %arg1: i32) -> (i32, i32, i32) {
    %c0_i32 = arith.constant 0 : i32
    %c0_i32_0 = arith.constant 0 : i32
    %c0_i32_1 = arith.constant 0 : i32
    return %arg1, %c0_i32, %c0_i32_0 : i32, i32, i32
  }
  func.func @transform_7(%arg0: i32, %arg1: i32) -> (i32, i32, i32) {
    %c0_i32 = arith.constant 0 : i32
    %c0_i32_0 = arith.constant 0 : i32
    %c0_i32_1 = arith.constant 0 : i32
    return %arg0, %c0_i32, %c0_i32_0 : i32, i32, i32
  }
  func.func @transform_8(%arg0: i32, %arg1: i32) -> (i32, i32, i32, i32) {
    %c0_i32 = arith.constant 0 : i32
    %c0_i32_0 = arith.constant 0 : i32
    %c0_i32_1 = arith.constant 0 : i32
    return %arg0, %arg1, %c0_i32, %c0_i32_0 : i32, i32, i32, i32
  }
}

module attributes {stable_mosaic.version = 11 : i64} {
  func.func @_oproj_add_ln_kernel(%arg0: i32, %arg1: i32, %arg2: memref<1x4x8x8xbf16, #tpu.memory_space<vmem>>, %arg3: memref<1x8x32xf32, #tpu.memory_space<vmem>>, %arg4: memref<4x8x32xbf16, #tpu.memory_space<vmem>>, %arg5: memref<1x32xf32, #tpu.memory_space<vmem>>, %arg6: memref<1x32xf32, #tpu.memory_space<vmem>>, %arg7: memref<1x32xf32, #tpu.memory_space<vmem>>, %arg8: memref<1x8x32xf32, #tpu.memory_space<vmem>>) attributes {dimension_semantics = [#tpu.dimension_semantics<parallel>, #tpu.dimension_semantics<parallel>], iteration_bounds = array<i64: 2, 1>, scalar_prefetch = 0 : i64, scratch_operands = 0 : i64, tpu.core_type = #tpu.core_type<tc>, window_params = [{transform_indices = @transform_0, window_bounds = array<i64: 1, 4, 8, 8>}, {transform_indices = @transform_1, window_bounds = array<i64: 1, 8, 32>}, {pipeline_mode = #tpu.pipeline_mode<synchronous>, transform_indices = @transform_2, window_bounds = array<i64: 4, 8, 32>}, {pipeline_mode = #tpu.pipeline_mode<synchronous>, transform_indices = @transform_3, window_bounds = array<i64: 1, 32>}, {pipeline_mode = #tpu.pipeline_mode<synchronous>, transform_indices = @transform_4, window_bounds = array<i64: 1, 32>}, {pipeline_mode = #tpu.pipeline_mode<synchronous>, transform_indices = @transform_5, window_bounds = array<i64: 1, 32>}, {transform_indices = @transform_6, window_bounds = array<i64: 1, 8, 32>}]} {
    %c0 = arith.constant 0 : index
    %c0_0 = arith.constant 0 : index
    %c0_1 = arith.constant 0 : index
    %c0_2 = arith.constant 0 : index
    %0 = vector.load %arg2[%c0, %c0_0, %c0_1, %c0_2] : memref<1x4x8x8xbf16, #tpu.memory_space<vmem>>, vector<1x1x8x8xbf16>
    %1 = vector.shape_cast %0 : vector<1x1x8x8xbf16> to vector<8x8xbf16>
    %c0_3 = arith.constant 0 : index
    %c0_4 = arith.constant 0 : index
    %c0_5 = arith.constant 0 : index
    %2 = vector.load %arg4[%c0_3, %c0_4, %c0_5] : memref<4x8x32xbf16, #tpu.memory_space<vmem>>, vector<1x8x32xbf16>
    %3 = vector.shape_cast %2 : vector<1x8x32xbf16> to vector<8x32xbf16>
    %cst = arith.constant dense<0.000000e+00> : vector<8x32xf32>
    %4 = tpu.matmul %1, %3, %cst {dimension_numbers = #tpu.dot_dimension_numbers<[1], [0], [0], [1], [0, 0, 1, 1], [], []>} : vector<8x8xbf16>, vector<8x32xbf16>, vector<8x32xf32> -> vector<8x32xf32>
    %c0_6 = arith.constant 0 : index
    %c1 = arith.constant 1 : index
    %c0_7 = arith.constant 0 : index
    %c0_8 = arith.constant 0 : index
    %5 = vector.load %arg2[%c0_6, %c1, %c0_7, %c0_8] : memref<1x4x8x8xbf16, #tpu.memory_space<vmem>>, vector<1x1x8x8xbf16>
    %6 = vector.shape_cast %5 : vector<1x1x8x8xbf16> to vector<8x8xbf16>
    %c1_9 = arith.constant 1 : index
    %c0_10 = arith.constant 0 : index
    %c0_11 = arith.constant 0 : index
    %7 = vector.load %arg4[%c1_9, %c0_10, %c0_11] : memref<4x8x32xbf16, #tpu.memory_space<vmem>>, vector<1x8x32xbf16>
    %8 = vector.shape_cast %7 : vector<1x8x32xbf16> to vector<8x32xbf16>
    %cst_12 = arith.constant dense<0.000000e+00> : vector<8x32xf32>
    %9 = tpu.matmul %6, %8, %cst_12 {dimension_numbers = #tpu.dot_dimension_numbers<[1], [0], [0], [1], [0, 0, 1, 1], [], []>} : vector<8x8xbf16>, vector<8x32xbf16>, vector<8x32xf32> -> vector<8x32xf32>
    %10 = arith.addf %4, %9 : vector<8x32xf32>
    %c0_13 = arith.constant 0 : index
    %c2 = arith.constant 2 : index
    %c0_14 = arith.constant 0 : index
    %c0_15 = arith.constant 0 : index
    %11 = vector.load %arg2[%c0_13, %c2, %c0_14, %c0_15] : memref<1x4x8x8xbf16, #tpu.memory_space<vmem>>, vector<1x1x8x8xbf16>
    %12 = vector.shape_cast %11 : vector<1x1x8x8xbf16> to vector<8x8xbf16>
    %c2_16 = arith.constant 2 : index
    %c0_17 = arith.constant 0 : index
    %c0_18 = arith.constant 0 : index
    %13 = vector.load %arg4[%c2_16, %c0_17, %c0_18] : memref<4x8x32xbf16, #tpu.memory_space<vmem>>, vector<1x8x32xbf16>
    %14 = vector.shape_cast %13 : vector<1x8x32xbf16> to vector<8x32xbf16>
    %cst_19 = arith.constant dense<0.000000e+00> : vector<8x32xf32>
    %15 = tpu.matmul %12, %14, %cst_19 {dimension_numbers = #tpu.dot_dimension_numbers<[1], [0], [0], [1], [0, 0, 1, 1], [], []>} : vector<8x8xbf16>, vector<8x32xbf16>, vector<8x32xf32> -> vector<8x32xf32>
    %16 = arith.addf %10, %15 : vector<8x32xf32>
    %c0_20 = arith.constant 0 : index
    %c3 = arith.constant 3 : index
    %c0_21 = arith.constant 0 : index
    %c0_22 = arith.constant 0 : index
    %17 = vector.load %arg2[%c0_20, %c3, %c0_21, %c0_22] : memref<1x4x8x8xbf16, #tpu.memory_space<vmem>>, vector<1x1x8x8xbf16>
    %18 = vector.shape_cast %17 : vector<1x1x8x8xbf16> to vector<8x8xbf16>
    %c3_23 = arith.constant 3 : index
    %c0_24 = arith.constant 0 : index
    %c0_25 = arith.constant 0 : index
    %19 = vector.load %arg4[%c3_23, %c0_24, %c0_25] : memref<4x8x32xbf16, #tpu.memory_space<vmem>>, vector<1x8x32xbf16>
    %20 = vector.shape_cast %19 : vector<1x8x32xbf16> to vector<8x32xbf16>
    %cst_26 = arith.constant dense<0.000000e+00> : vector<8x32xf32>
    %21 = tpu.matmul %18, %20, %cst_26 {dimension_numbers = #tpu.dot_dimension_numbers<[1], [0], [0], [1], [0, 0, 1, 1], [], []>} : vector<8x8xbf16>, vector<8x32xbf16>, vector<8x32xf32> -> vector<8x32xf32>
    %22 = arith.addf %16, %21 : vector<8x32xf32>
    %c0_27 = arith.constant 0 : index
    %c0_28 = arith.constant 0 : index
    %c0_29 = arith.constant 0 : index
    %23 = vector.load %arg3[%c0_27, %c0_28, %c0_29] : memref<1x8x32xf32, #tpu.memory_space<vmem>>, vector<1x8x32xf32>
    %24 = vector.shape_cast %23 : vector<1x8x32xf32> to vector<8x32xf32>
    %25 = arith.addf %24, %22 : vector<8x32xf32>
    %c0_30 = arith.constant 0 : index
    %c0_31 = arith.constant 0 : index
    %26 = vector.load %arg5[%c0_30, %c0_31] : memref<1x32xf32, #tpu.memory_space<vmem>>, vector<1x32xf32>
    %27 = vector.broadcast %26 : vector<1x32xf32> to vector<8x32xf32>
    %28 = arith.addf %25, %27 : vector<8x32xf32>
    %cst_32 = arith.constant dense<0.000000e+00> : vector<8xf32>
    %29 = vector.multi_reduction <add>, %28, %cst_32 [1] : vector<8x32xf32> to vector<8xf32>
    %30 = vector.shape_cast %29 : vector<8xf32> to vector<8x1xf32>
    %cst_33 = arith.constant 3.200000e+01 : f32
    %31 = vector.broadcast %cst_33 : f32 to vector<8x1xf32>
    %32 = arith.divf %30, %31 : vector<8x1xf32>
    %33 = vector.broadcast %32 : vector<8x1xf32> to vector<8x32xf32>
    %34 = arith.subf %28, %33 : vector<8x32xf32>
    %35 = arith.mulf %34, %34 : vector<8x32xf32>
    %cst_34 = arith.constant dense<0.000000e+00> : vector<8xf32>
    %36 = vector.multi_reduction <add>, %35, %cst_34 [1] : vector<8x32xf32> to vector<8xf32>
    %37 = vector.shape_cast %36 : vector<8xf32> to vector<8x1xf32>
    %cst_35 = arith.constant 3.200000e+01 : f32
    %38 = vector.broadcast %cst_35 : f32 to vector<8x1xf32>
    %39 = arith.divf %37, %38 : vector<8x1xf32>
    %40 = vector.broadcast %32 : vector<8x1xf32> to vector<8x32xf32>
    %41 = arith.subf %28, %40 : vector<8x32xf32>
    %cst_36 = arith.constant 9.99999974E-6 : f32
    %42 = vector.broadcast %cst_36 : f32 to vector<8x1xf32>
    %43 = arith.addf %39, %42 : vector<8x1xf32>
    %44 = math.rsqrt %43 : vector<8x1xf32>
    %45 = vector.broadcast %44 : vector<8x1xf32> to vector<8x32xf32>
    %46 = arith.mulf %41, %45 : vector<8x32xf32>
    %c0_37 = arith.constant 0 : index
    %c0_38 = arith.constant 0 : index
    %47 = vector.load %arg6[%c0_37, %c0_38] : memref<1x32xf32, #tpu.memory_space<vmem>>, vector<1x32xf32>
    %48 = vector.broadcast %47 : vector<1x32xf32> to vector<8x32xf32>
    %49 = arith.mulf %46, %48 : vector<8x32xf32>
    %c0_39 = arith.constant 0 : index
    %c0_40 = arith.constant 0 : index
    %50 = vector.load %arg7[%c0_39, %c0_40] : memref<1x32xf32, #tpu.memory_space<vmem>>, vector<1x32xf32>
    %51 = vector.broadcast %50 : vector<1x32xf32> to vector<8x32xf32>
    %52 = arith.addf %49, %51 : vector<8x32xf32>
    %c0_41 = arith.constant 0 : index
    %c0_42 = arith.constant 0 : index
    %c0_43 = arith.constant 0 : index
    %53 = vector.load %arg8[%c0_41, %c0_42, %c0_43] : memref<1x8x32xf32, #tpu.memory_space<vmem>>, vector<1x8x32xf32>
    %54 = vector.shape_cast %53 : vector<1x8x32xf32> to vector<8x32xf32>
    %55 = vector.shape_cast %52 : vector<8x32xf32> to vector<1x8x32xf32>
    tpu.vector_store %arg8[%c0_41, %c0_42, %c0_43], %55 {strides = array<i32>} : memref<1x8x32xf32, #tpu.memory_space<vmem>>, vector<1x8x32xf32>,
    return
  }
  func.func @transform_0(%arg0: i32, %arg1: i32) -> (i32, i32, i32, i32) {
    %c0_i32 = arith.constant 0 : i32
    %c0_i32_0 = arith.constant 0 : i32
    %c0_i32_1 = arith.constant 0 : i32
    return %arg0, %c0_i32, %arg1, %c0_i32_0 : i32, i32, i32, i32
  }
  func.func @transform_1(%arg0: i32, %arg1: i32) -> (i32, i32, i32) {
    %c0_i32 = arith.constant 0 : i32
    %c0_i32_0 = arith.constant 0 : i32
    return %arg0, %arg1, %c0_i32 : i32, i32, i32
  }
  func.func @transform_2(%arg0: i32, %arg1: i32) -> (i32, i32, i32) {
    %c0_i32 = arith.constant 0 : i32
    %c0_i32_0 = arith.constant 0 : i32
    %c0_i32_1 = arith.constant 0 : i32
    %c0_i32_2 = arith.constant 0 : i32
    return %c0_i32, %c0_i32_0, %c0_i32_1 : i32, i32, i32
  }
  func.func @transform_3(%arg0: i32, %arg1: i32) -> (i32, i32) {
    %c0_i32 = arith.constant 0 : i32
    %c0_i32_0 = arith.constant 0 : i32
    %c0_i32_1 = arith.constant 0 : i32
    return %c0_i32, %c0_i32_0 : i32, i32
  }
  func.func @transform_4(%arg0: i32, %arg1: i32) -> (i32, i32) {
    %c0_i32 = arith.constant 0 : i32
    %c0_i32_0 = arith.constant 0 : i32
    %c0_i32_1 = arith.constant 0 : i32
    return %c0_i32, %c0_i32_0 : i32, i32
  }
  func.func @transform_5(%arg0: i32, %arg1: i32) -> (i32, i32) {
    %c0_i32 = arith.constant 0 : i32
    %c0_i32_0 = arith.constant 0 : i32
    %c0_i32_1 = arith.constant 0 : i32
    return %c0_i32, %c0_i32_0 : i32, i32
  }
  func.func @transform_6(%arg0: i32, %arg1: i32) -> (i32, i32, i32) {
    %c0_i32 = arith.constant 0 : i32
    %c0_i32_0 = arith.constant 0 : i32
    return %arg0, %arg1, %c0_i32 : i32, i32, i32
  }
}

module attributes {stable_mosaic.version = 11 : i64} {
  func.func @_cross_attn_kernel(%arg0: i32, %arg1: i32, %arg2: memref<1x8x32xf32, #tpu.memory_space<vmem>>, %arg3: memref<1x12x32xf32, #tpu.memory_space<vmem>>, %arg4: memref<1x32x8xbf16, #tpu.memory_space<vmem>>, %arg5: memref<1x1x8xf32, #tpu.memory_space<vmem>>, %arg6: memref<1x32x8xbf16, #tpu.memory_space<vmem>>, %arg7: memref<1x1x8xf32, #tpu.memory_space<vmem>>, %arg8: memref<1x32x8xbf16, #tpu.memory_space<vmem>>, %arg9: memref<1x1x8xf32, #tpu.memory_space<vmem>>, %arg10: memref<1x1x12xf32, #tpu.memory_space<vmem>>, %arg11: memref<1x1x8x8xbf16, #tpu.memory_space<vmem>>) attributes {dimension_semantics = [#tpu.dimension_semantics<parallel>, #tpu.dimension_semantics<parallel>], iteration_bounds = array<i64: 2, 4>, scalar_prefetch = 0 : i64, scratch_operands = 0 : i64, tpu.core_type = #tpu.core_type<tc>, window_params = [{transform_indices = @transform_0, window_bounds = array<i64: 1, 8, 32>}, {transform_indices = @transform_1, window_bounds = array<i64: 1, 12, 32>}, {transform_indices = @transform_2, window_bounds = array<i64: 1, 32, 8>}, {transform_indices = @transform_3, window_bounds = array<i64: 1, 1, 8>}, {transform_indices = @transform_4, window_bounds = array<i64: 1, 32, 8>}, {transform_indices = @transform_5, window_bounds = array<i64: 1, 1, 8>}, {transform_indices = @transform_6, window_bounds = array<i64: 1, 32, 8>}, {transform_indices = @transform_7, window_bounds = array<i64: 1, 1, 8>}, {transform_indices = @transform_8, window_bounds = array<i64: 1, 1, 12>}, {transform_indices = @transform_9, window_bounds = array<i64: 1, 1, 8, 8>}]} {
    %c0 = arith.constant 0 : index
    %c0_0 = arith.constant 0 : index
    %c0_1 = arith.constant 0 : index
    %0 = vector.load %arg2[%c0, %c0_0, %c0_1] : memref<1x8x32xf32, #tpu.memory_space<vmem>>, vector<1x8x32xf32>
    %1 = vector.shape_cast %0 : vector<1x8x32xf32> to vector<8x32xf32>
    %2 = arith.truncf %1 : vector<8x32xf32> to vector<8x32xbf16>
    %c0_2 = arith.constant 0 : index
    %c0_3 = arith.constant 0 : index
    %c0_4 = arith.constant 0 : index
    %3 = vector.load %arg3[%c0_2, %c0_3, %c0_4] : memref<1x12x32xf32, #tpu.memory_space<vmem>>, vector<1x12x32xf32>
    %4 = vector.shape_cast %3 : vector<1x12x32xf32> to vector<12x32xf32>
    %5 = arith.truncf %4 : vector<12x32xf32> to vector<12x32xbf16>
    %c0_5 = arith.constant 0 : index
    %c0_6 = arith.constant 0 : index
    %c0_7 = arith.constant 0 : index
    %6 = vector.load %arg4[%c0_5, %c0_6, %c0_7] : memref<1x32x8xbf16, #tpu.memory_space<vmem>>, vector<1x32x8xbf16>
    %7 = vector.shape_cast %6 : vector<1x32x8xbf16> to vector<32x8xbf16>
    %cst = arith.constant dense<0.000000e+00> : vector<8x8xf32>
    %8 = tpu.matmul %2, %7, %cst {dimension_numbers = #tpu.dot_dimension_numbers<[1], [0], [0], [1], [0, 0, 1, 1], [], []>} : vector<8x32xbf16>, vector<32x8xbf16>, vector<8x8xf32> -> vector<8x8xf32>
    %c0_8 = arith.constant 0 : index
    %c0_9 = arith.constant 0 : index
    %c0_10 = arith.constant 0 : index
    %9 = vector.load %arg5[%c0_8, %c0_9, %c0_10] : memref<1x1x8xf32, #tpu.memory_space<vmem>>, vector<1x1x8xf32>
    %10 = vector.shape_cast %9 : vector<1x1x8xf32> to vector<1x8xf32>
    %11 = vector.broadcast %10 : vector<1x8xf32> to vector<8x8xf32>
    %12 = arith.addf %8, %11 : vector<8x8xf32>
    %c0_11 = arith.constant 0 : index
    %c0_12 = arith.constant 0 : index
    %c0_13 = arith.constant 0 : index
    %13 = vector.load %arg6[%c0_11, %c0_12, %c0_13] : memref<1x32x8xbf16, #tpu.memory_space<vmem>>, vector<1x32x8xbf16>
    %14 = vector.shape_cast %13 : vector<1x32x8xbf16> to vector<32x8xbf16>
    %cst_14 = arith.constant dense<0.000000e+00> : vector<12x8xf32>
    %15 = tpu.matmul %5, %14, %cst_14 {dimension_numbers = #tpu.dot_dimension_numbers<[1], [0], [0], [1], [0, 0, 1, 1], [], []>} : vector<12x32xbf16>, vector<32x8xbf16>, vector<12x8xf32> -> vector<12x8xf32>
    %c0_15 = arith.constant 0 : index
    %c0_16 = arith.constant 0 : index
    %c0_17 = arith.constant 0 : index
    %16 = vector.load %arg7[%c0_15, %c0_16, %c0_17] : memref<1x1x8xf32, #tpu.memory_space<vmem>>, vector<1x1x8xf32>
    %17 = vector.shape_cast %16 : vector<1x1x8xf32> to vector<1x8xf32>
    %18 = vector.broadcast %17 : vector<1x8xf32> to vector<12x8xf32>
    %19 = arith.addf %15, %18 : vector<12x8xf32>
    %c0_18 = arith.constant 0 : index
    %c0_19 = arith.constant 0 : index
    %c0_20 = arith.constant 0 : index
    %20 = vector.load %arg8[%c0_18, %c0_19, %c0_20] : memref<1x32x8xbf16, #tpu.memory_space<vmem>>, vector<1x32x8xbf16>
    %21 = vector.shape_cast %20 : vector<1x32x8xbf16> to vector<32x8xbf16>
    %cst_21 = arith.constant dense<0.000000e+00> : vector<12x8xf32>
    %22 = tpu.matmul %5, %21, %cst_21 {dimension_numbers = #tpu.dot_dimension_numbers<[1], [0], [0], [1], [0, 0, 1, 1], [], []>} : vector<12x32xbf16>, vector<32x8xbf16>, vector<12x8xf32> -> vector<12x8xf32>
    %c0_22 = arith.constant 0 : index
    %c0_23 = arith.constant 0 : index
    %c0_24 = arith.constant 0 : index
    %23 = vector.load %arg9[%c0_22, %c0_23, %c0_24] : memref<1x1x8xf32, #tpu.memory_space<vmem>>, vector<1x1x8xf32>
    %24 = vector.shape_cast %23 : vector<1x1x8xf32> to vector<1x8xf32>
    %25 = vector.broadcast %24 : vector<1x8xf32> to vector<12x8xf32>
    %26 = arith.addf %22, %25 : vector<12x8xf32>
    %c0_25 = arith.constant 0 : index
    %c0_26 = arith.constant 0 : index
    %c0_27 = arith.constant 0 : index
    %27 = vector.load %arg10[%c0_25, %c0_26, %c0_27] : memref<1x1x12xf32, #tpu.memory_space<vmem>>, vector<1x1x12xf32>
    %28 = vector.shape_cast %27 : vector<1x1x12xf32> to vector<1x12xf32>
    %cst_28 = arith.constant 5.000000e-01 : f32
    %29 = vector.broadcast %cst_28 : f32 to vector<1x12xf32>
    %30 = arith.cmpf ogt, %28, %29 : vector<1x12xf32>
    %cst_29 = arith.constant 0.000000e+00 : f32
    %cst_30 = arith.constant -1.000000e+09 : f32
    %31 = vector.broadcast %cst_29 : f32 to vector<1x12xf32>
    %32 = vector.broadcast %cst_30 : f32 to vector<1x12xf32>
    %33 = arith.select %30, %31, %32 : vector<1x12xi1>, vector<1x12xf32>
    %34 = arith.truncf %12 : vector<8x8xf32> to vector<8x8xbf16>
    %35 = arith.truncf %19 : vector<12x8xf32> to vector<12x8xbf16>
    %cst_31 = arith.constant dense<0.000000e+00> : vector<8x12xf32>
    %36 = tpu.matmul %34, %35, %cst_31 {dimension_numbers = #tpu.dot_dimension_numbers<[1], [1], [0], [0], [0, 0, 1, 0], [], []>} : vector<8x8xbf16>, vector<12x8xbf16>, vector<8x12xf32> -> vector<8x12xf32>
    %37 = vector.broadcast %33 : vector<1x12xf32> to vector<8x12xf32>
    %38 = arith.addf %36, %37 : vector<8x12xf32>
    %cst_32 = arith.constant dense<0xFF800000> : vector<8xf32>
    %39 = vector.multi_reduction <maximumf>, %38, %cst_32 [1] : vector<8x12xf32> to vector<8xf32>
    %40 = vector.shape_cast %39 : vector<8xf32> to vector<8x1xf32>
    %41 = vector.broadcast %40 : vector<8x1xf32> to vector<8x12xf32>
    %42 = arith.subf %38, %41 : vector<8x12xf32>
    %43 = math.exp %42 : vector<8x12xf32>
    %cst_33 = arith.constant dense<0.000000e+00> : vector<8xf32>
    %44 = vector.multi_reduction <add>, %43, %cst_33 [1] : vector<8x12xf32> to vector<8xf32>
    %45 = vector.shape_cast %44 : vector<8xf32> to vector<8x1xf32>
    %46 = arith.truncf %43 : vector<8x12xf32> to vector<8x12xbf16>
    %47 = arith.truncf %26 : vector<12x8xf32> to vector<12x8xbf16>
    %cst_34 = arith.constant dense<0.000000e+00> : vector<8x8xf32>
    %48 = tpu.matmul %46, %47, %cst_34 {dimension_numbers = #tpu.dot_dimension_numbers<[1], [0], [0], [1], [0, 0, 1, 1], [], []>} : vector<8x12xbf16>, vector<12x8xbf16>, vector<8x8xf32> -> vector<8x8xf32>
    %49 = tpu.reciprocal %45 {approx = true} : vector<8x1xf32> -> vector<8x1xf32>
    %50 = vector.broadcast %49 : vector<8x1xf32> to vector<8x8xf32>
    %51 = arith.mulf %48, %50 : vector<8x8xf32>
    %52 = arith.truncf %51 : vector<8x8xf32> to vector<8x8xbf16>
    %c0_35 = arith.constant 0 : index
    %c0_36 = arith.constant 0 : index
    %c0_37 = arith.constant 0 : index
    %c0_38 = arith.constant 0 : index
    %53 = vector.load %arg11[%c0_35, %c0_36, %c0_37, %c0_38] : memref<1x1x8x8xbf16, #tpu.memory_space<vmem>>, vector<1x1x8x8xbf16>
    %54 = vector.shape_cast %53 : vector<1x1x8x8xbf16> to vector<8x8xbf16>
    %55 = vector.shape_cast %52 : vector<8x8xbf16> to vector<1x1x8x8xbf16>
    tpu.vector_store %arg11[%c0_35, %c0_36, %c0_37, %c0_38], %55 {strides = array<i32>} : memref<1x1x8x8xbf16, #tpu.memory_space<vmem>>, vector<1x1x8x8xbf16>,
    return
  }
  func.func @transform_0(%arg0: i32, %arg1: i32) -> (i32, i32, i32) {
    %c0_i32 = arith.constant 0 : i32
    %c0_i32_0 = arith.constant 0 : i32
    %c0_i32_1 = arith.constant 0 : i32
    return %arg0, %c0_i32, %c0_i32_0 : i32, i32, i32
  }
  func.func @transform_1(%arg0: i32, %arg1: i32) -> (i32, i32, i32) {
    %c0_i32 = arith.constant 0 : i32
    %c0_i32_0 = arith.constant 0 : i32
    %c0_i32_1 = arith.constant 0 : i32
    return %arg0, %c0_i32, %c0_i32_0 : i32, i32, i32
  }
  func.func @transform_2(%arg0: i32, %arg1: i32) -> (i32, i32, i32) {
    %c0_i32 = arith.constant 0 : i32
    %c0_i32_0 = arith.constant 0 : i32
    %c0_i32_1 = arith.constant 0 : i32
    return %arg1, %c0_i32, %c0_i32_0 : i32, i32, i32
  }
  func.func @transform_3(%arg0: i32, %arg1: i32) -> (i32, i32, i32) {
    %c0_i32 = arith.constant 0 : i32
    %c0_i32_0 = arith.constant 0 : i32
    %c0_i32_1 = arith.constant 0 : i32
    return %arg1, %c0_i32, %c0_i32_0 : i32, i32, i32
  }
  func.func @transform_4(%arg0: i32, %arg1: i32) -> (i32, i32, i32) {
    %c0_i32 = arith.constant 0 : i32
    %c0_i32_0 = arith.constant 0 : i32
    %c0_i32_1 = arith.constant 0 : i32
    return %arg1, %c0_i32, %c0_i32_0 : i32, i32, i32
  }
  func.func @transform_5(%arg0: i32, %arg1: i32) -> (i32, i32, i32) {
    %c0_i32 = arith.constant 0 : i32
    %c0_i32_0 = arith.constant 0 : i32
    %c0_i32_1 = arith.constant 0 : i32
    return %arg1, %c0_i32, %c0_i32_0 : i32, i32, i32
  }
  func.func @transform_6(%arg0: i32, %arg1: i32) -> (i32, i32, i32) {
    %c0_i32 = arith.constant 0 : i32
    %c0_i32_0 = arith.constant 0 : i32
    %c0_i32_1 = arith.constant 0 : i32
    return %arg1, %c0_i32, %c0_i32_0 : i32, i32, i32
  }
  func.func @transform_7(%arg0: i32, %arg1: i32) -> (i32, i32, i32) {
    %c0_i32 = arith.constant 0 : i32
    %c0_i32_0 = arith.constant 0 : i32
    %c0_i32_1 = arith.constant 0 : i32
    return %arg1, %c0_i32, %c0_i32_0 : i32, i32, i32
  }
  func.func @transform_8(%arg0: i32, %arg1: i32) -> (i32, i32, i32) {
    %c0_i32 = arith.constant 0 : i32
    %c0_i32_0 = arith.constant 0 : i32
    %c0_i32_1 = arith.constant 0 : i32
    return %arg0, %c0_i32, %c0_i32_0 : i32, i32, i32
  }
  func.func @transform_9(%arg0: i32, %arg1: i32) -> (i32, i32, i32, i32) {
    %c0_i32 = arith.constant 0 : i32
    %c0_i32_0 = arith.constant 0 : i32
    %c0_i32_1 = arith.constant 0 : i32
    return %arg0, %arg1, %c0_i32, %c0_i32_0 : i32, i32, i32, i32
  }
}

module attributes {stable_mosaic.version = 11 : i64} {
  func.func @_ffn_add_ln_kernel(%arg0: i32, %arg1: memref<16x32xf32, #tpu.memory_space<vmem>>, %arg2: memref<32x64xbf16, #tpu.memory_space<vmem>>, %arg3: memref<1x64xf32, #tpu.memory_space<vmem>>, %arg4: memref<64x32xbf16, #tpu.memory_space<vmem>>, %arg5: memref<1x32xf32, #tpu.memory_space<vmem>>, %arg6: memref<1x32xf32, #tpu.memory_space<vmem>>, %arg7: memref<1x32xf32, #tpu.memory_space<vmem>>, %arg8: memref<16x32xf32, #tpu.memory_space<vmem>>) attributes {dimension_semantics = [#tpu.dimension_semantics<parallel>], iteration_bounds = array<i64: 1>, scalar_prefetch = 0 : i64, scratch_operands = 0 : i64, tpu.core_type = #tpu.core_type<tc>, window_params = [{transform_indices = @transform_0, window_bounds = array<i64: 16, 32>}, {pipeline_mode = #tpu.pipeline_mode<synchronous>, transform_indices = @transform_1, window_bounds = array<i64: 32, 64>}, {pipeline_mode = #tpu.pipeline_mode<synchronous>, transform_indices = @transform_2, window_bounds = array<i64: 1, 64>}, {pipeline_mode = #tpu.pipeline_mode<synchronous>, transform_indices = @transform_3, window_bounds = array<i64: 64, 32>}, {pipeline_mode = #tpu.pipeline_mode<synchronous>, transform_indices = @transform_4, window_bounds = array<i64: 1, 32>}, {pipeline_mode = #tpu.pipeline_mode<synchronous>, transform_indices = @transform_5, window_bounds = array<i64: 1, 32>}, {pipeline_mode = #tpu.pipeline_mode<synchronous>, transform_indices = @transform_6, window_bounds = array<i64: 1, 32>}, {transform_indices = @transform_7, window_bounds = array<i64: 16, 32>}]} {
    %c0 = arith.constant 0 : index
    %c0_0 = arith.constant 0 : index
    %0 = vector.load %arg1[%c0, %c0_0] : memref<16x32xf32, #tpu.memory_space<vmem>>, vector<16x32xf32>
    %1 = arith.truncf %0 : vector<16x32xf32> to vector<16x32xbf16>
    %c0_1 = arith.constant 0 : index
    %c0_2 = arith.constant 0 : index
    %2 = vector.load %arg2[%c0_1, %c0_2] : memref<32x64xbf16, #tpu.memory_space<vmem>>, vector<32x64xbf16>
    %cst = arith.constant dense<0.000000e+00> : vector<16x64xf32>
    %3 = tpu.matmul %1, %2, %cst {dimension_numbers = #tpu.dot_dimension_numbers<[1], [0], [0], [1], [0, 0, 1, 1], [], []>} : vector<16x32xbf16>, vector<32x64xbf16>, vector<16x64xf32> -> vector<16x64xf32>
    %c0_3 = arith.constant 0 : index
    %c0_4 = arith.constant 0 : index
    %4 = vector.load %arg3[%c0_3, %c0_4] : memref<1x64xf32, #tpu.memory_space<vmem>>, vector<1x64xf32>
    %5 = vector.broadcast %4 : vector<1x64xf32> to vector<16x64xf32>
    %6 = arith.addf %3, %5 : vector<16x64xf32>
    %cst_5 = arith.constant 0.000000e+00 : f32
    %7 = vector.broadcast %cst_5 : f32 to vector<16x64xf32>
    %8 = arith.maximumf %6, %7 : vector<16x64xf32>
    %9 = arith.truncf %8 : vector<16x64xf32> to vector<16x64xbf16>
    %c0_6 = arith.constant 0 : index
    %c0_7 = arith.constant 0 : index
    %10 = vector.load %arg4[%c0_6, %c0_7] : memref<64x32xbf16, #tpu.memory_space<vmem>>, vector<64x32xbf16>
    %cst_8 = arith.constant dense<0.000000e+00> : vector<16x32xf32>
    %11 = tpu.matmul %9, %10, %cst_8 {dimension_numbers = #tpu.dot_dimension_numbers<[1], [0], [0], [1], [0, 0, 1, 1], [], []>} : vector<16x64xbf16>, vector<64x32xbf16>, vector<16x32xf32> -> vector<16x32xf32>
    %c0_9 = arith.constant 0 : index
    %c0_10 = arith.constant 0 : index
    %12 = vector.load %arg5[%c0_9, %c0_10] : memref<1x32xf32, #tpu.memory_space<vmem>>, vector<1x32xf32>
    %13 = vector.broadcast %12 : vector<1x32xf32> to vector<16x32xf32>
    %14 = arith.addf %11, %13 : vector<16x32xf32>
    %15 = arith.addf %0, %14 : vector<16x32xf32>
    %cst_11 = arith.constant dense<0.000000e+00> : vector<16xf32>
    %16 = vector.multi_reduction <add>, %15, %cst_11 [1] : vector<16x32xf32> to vector<16xf32>
    %17 = vector.shape_cast %16 : vector<16xf32> to vector<16x1xf32>
    %cst_12 = arith.constant 3.200000e+01 : f32
    %18 = vector.broadcast %cst_12 : f32 to vector<16x1xf32>
    %19 = arith.divf %17, %18 : vector<16x1xf32>
    %20 = vector.broadcast %19 : vector<16x1xf32> to vector<16x32xf32>
    %21 = arith.subf %15, %20 : vector<16x32xf32>
    %22 = arith.mulf %21, %21 : vector<16x32xf32>
    %cst_13 = arith.constant dense<0.000000e+00> : vector<16xf32>
    %23 = vector.multi_reduction <add>, %22, %cst_13 [1] : vector<16x32xf32> to vector<16xf32>
    %24 = vector.shape_cast %23 : vector<16xf32> to vector<16x1xf32>
    %cst_14 = arith.constant 3.200000e+01 : f32
    %25 = vector.broadcast %cst_14 : f32 to vector<16x1xf32>
    %26 = arith.divf %24, %25 : vector<16x1xf32>
    %27 = vector.broadcast %19 : vector<16x1xf32> to vector<16x32xf32>
    %28 = arith.subf %15, %27 : vector<16x32xf32>
    %cst_15 = arith.constant 9.99999974E-6 : f32
    %29 = vector.broadcast %cst_15 : f32 to vector<16x1xf32>
    %30 = arith.addf %26, %29 : vector<16x1xf32>
    %31 = math.rsqrt %30 : vector<16x1xf32>
    %32 = vector.broadcast %31 : vector<16x1xf32> to vector<16x32xf32>
    %33 = arith.mulf %28, %32 : vector<16x32xf32>
    %c0_16 = arith.constant 0 : index
    %c0_17 = arith.constant 0 : index
    %34 = vector.load %arg6[%c0_16, %c0_17] : memref<1x32xf32, #tpu.memory_space<vmem>>, vector<1x32xf32>
    %35 = vector.broadcast %34 : vector<1x32xf32> to vector<16x32xf32>
    %36 = arith.mulf %33, %35 : vector<16x32xf32>
    %c0_18 = arith.constant 0 : index
    %c0_19 = arith.constant 0 : index
    %37 = vector.load %arg7[%c0_18, %c0_19] : memref<1x32xf32, #tpu.memory_space<vmem>>, vector<1x32xf32>
    %38 = vector.broadcast %37 : vector<1x32xf32> to vector<16x32xf32>
    %39 = arith.addf %36, %38 : vector<16x32xf32>
    %c0_20 = arith.constant 0 : index
    %c0_21 = arith.constant 0 : index
    %40 = vector.load %arg8[%c0_20, %c0_21] : memref<16x32xf32, #tpu.memory_space<vmem>>, vector<16x32xf32>
    tpu.vector_store %arg8[%c0_20, %c0_21], %39 {strides = array<i32>} : memref<16x32xf32, #tpu.memory_space<vmem>>, vector<16x32xf32>,
    return
  }
  func.func @transform_0(%arg0: i32) -> (i32, i32) {
    %c0_i32 = arith.constant 0 : i32
    %c0_i32_0 = arith.constant 0 : i32
    return %arg0, %c0_i32 : i32, i32
  }
  func.func @transform_1(%arg0: i32) -> (i32, i32) {
    %c0_i32 = arith.constant 0 : i32
    %c0_i32_0 = arith.constant 0 : i32
    %c0_i32_1 = arith.constant 0 : i32
    return %c0_i32, %c0_i32_0 : i32, i32
  }
  func.func @transform_2(%arg0: i32) -> (i32, i32) {
    %c0_i32 = arith.constant 0 : i32
    %c0_i32_0 = arith.constant 0 : i32
    %c0_i32_1 = arith.constant 0 : i32
    return %c0_i32, %c0_i32_0 : i32, i32
  }
  func.func @transform_3(%arg0: i32) -> (i32, i32) {
    %c0_i32 = arith.constant 0 : i32
    %c0_i32_0 = arith.constant 0 : i32
    %c0_i32_1 = arith.constant 0 : i32
    return %c0_i32, %c0_i32_0 : i32, i32
  }
  func.func @transform_4(%arg0: i32) -> (i32, i32) {
    %c0_i32 = arith.constant 0 : i32
    %c0_i32_0 = arith.constant 0 : i32
    %c0_i32_1 = arith.constant 0 : i32
    return %c0_i32, %c0_i32_0 : i32, i32
  }
  func.func @transform_5(%arg0: i32) -> (i32, i32) {
    %c0_i32 = arith.constant 0 : i32
    %c0_i32_0 = arith.constant 0 : i32
    %c0_i32_1 = arith.constant 0 : i32
    return %c0_i32, %c0_i32_0 : i32, i32
  }
  func.func @transform_6(%arg0: i32) -> (i32, i32) {
    %c0_i32 = arith.constant 0 : i32
    %c0_i32_0 = arith.constant 0 : i32
    %c0_i32_1 = arith.constant 0 : i32
    return %c0_i32, %c0_i32_0 : i32, i32
  }
  func.func @transform_7(%arg0: i32) -> (i32, i32) {
    %c0_i32 = arith.constant 0 : i32
    %c0_i32_0 = arith.constant 0 : i32
    return %arg0, %c0_i32 : i32, i32
  }
}

module attributes {stable_mosaic.version = 11 : i64} {
  func.func @_ffn_add_ln_kernel(%arg0: i32, %arg1: memref<16x32xf32, #tpu.memory_space<vmem>>, %arg2: memref<32x64xbf16, #tpu.memory_space<vmem>>, %arg3: memref<1x64xf32, #tpu.memory_space<vmem>>, %arg4: memref<64x32xbf16, #tpu.memory_space<vmem>>, %arg5: memref<1x32xf32, #tpu.memory_space<vmem>>, %arg6: memref<1x32xf32, #tpu.memory_space<vmem>>, %arg7: memref<1x32xf32, #tpu.memory_space<vmem>>, %arg8: memref<16x32xf32, #tpu.memory_space<vmem>>) attributes {dimension_semantics = [#tpu.dimension_semantics<parallel>], iteration_bounds = array<i64: 1>, scalar_prefetch = 0 : i64, scratch_operands = 0 : i64, tpu.core_type = #tpu.core_type<tc>, window_params = [{transform_indices = @transform_0, window_bounds = array<i64: 16, 32>}, {pipeline_mode = #tpu.pipeline_mode<synchronous>, transform_indices = @transform_1, window_bounds = array<i64: 32, 64>}, {pipeline_mode = #tpu.pipeline_mode<synchronous>, transform_indices = @transform_2, window_bounds = array<i64: 1, 64>}, {pipeline_mode = #tpu.pipeline_mode<synchronous>, transform_indices = @transform_3, window_bounds = array<i64: 64, 32>}, {pipeline_mode = #tpu.pipeline_mode<synchronous>, transform_indices = @transform_4, window_bounds = array<i64: 1, 32>}, {pipeline_mode = #tpu.pipeline_mode<synchronous>, transform_indices = @transform_5, window_bounds = array<i64: 1, 32>}, {pipeline_mode = #tpu.pipeline_mode<synchronous>, transform_indices = @transform_6, window_bounds = array<i64: 1, 32>}, {transform_indices = @transform_7, window_bounds = array<i64: 16, 32>}]} {
    %c0 = arith.constant 0 : index
    %c0_0 = arith.constant 0 : index
    %0 = vector.load %arg1[%c0, %c0_0] : memref<16x32xf32, #tpu.memory_space<vmem>>, vector<16x32xf32>
    %1 = arith.truncf %0 : vector<16x32xf32> to vector<16x32xbf16>
    %c0_1 = arith.constant 0 : index
    %c0_2 = arith.constant 0 : index
    %2 = vector.load %arg2[%c0_1, %c0_2] : memref<32x64xbf16, #tpu.memory_space<vmem>>, vector<32x64xbf16>
    %cst = arith.constant dense<0.000000e+00> : vector<16x64xf32>
    %3 = tpu.matmul %1, %2, %cst {dimension_numbers = #tpu.dot_dimension_numbers<[1], [0], [0], [1], [0, 0, 1, 1], [], []>} : vector<16x32xbf16>, vector<32x64xbf16>, vector<16x64xf32> -> vector<16x64xf32>
    %c0_3 = arith.constant 0 : index
    %c0_4 = arith.constant 0 : index
    %4 = vector.load %arg3[%c0_3, %c0_4] : memref<1x64xf32, #tpu.memory_space<vmem>>, vector<1x64xf32>
    %5 = vector.broadcast %4 : vector<1x64xf32> to vector<16x64xf32>
    %6 = arith.addf %3, %5 : vector<16x64xf32>
    %cst_5 = arith.constant 0.000000e+00 : f32
    %7 = vector.broadcast %cst_5 : f32 to vector<16x64xf32>
    %8 = arith.maximumf %6, %7 : vector<16x64xf32>
    %9 = arith.truncf %8 : vector<16x64xf32> to vector<16x64xbf16>
    %c0_6 = arith.constant 0 : index
    %c0_7 = arith.constant 0 : index
    %10 = vector.load %arg4[%c0_6, %c0_7] : memref<64x32xbf16, #tpu.memory_space<vmem>>, vector<64x32xbf16>
    %cst_8 = arith.constant dense<0.000000e+00> : vector<16x32xf32>
    %11 = tpu.matmul %9, %10, %cst_8 {dimension_numbers = #tpu.dot_dimension_numbers<[1], [0], [0], [1], [0, 0, 1, 1], [], []>} : vector<16x64xbf16>, vector<64x32xbf16>, vector<16x32xf32> -> vector<16x32xf32>
    %c0_9 = arith.constant 0 : index
    %c0_10 = arith.constant 0 : index
    %12 = vector.load %arg5[%c0_9, %c0_10] : memref<1x32xf32, #tpu.memory_space<vmem>>, vector<1x32xf32>
    %13 = vector.broadcast %12 : vector<1x32xf32> to vector<16x32xf32>
    %14 = arith.addf %11, %13 : vector<16x32xf32>
    %15 = arith.addf %0, %14 : vector<16x32xf32>
    %cst_11 = arith.constant dense<0.000000e+00> : vector<16xf32>
    %16 = vector.multi_reduction <add>, %15, %cst_11 [1] : vector<16x32xf32> to vector<16xf32>
    %17 = vector.shape_cast %16 : vector<16xf32> to vector<16x1xf32>
    %cst_12 = arith.constant 3.200000e+01 : f32
    %18 = vector.broadcast %cst_12 : f32 to vector<16x1xf32>
    %19 = arith.divf %17, %18 : vector<16x1xf32>
    %20 = vector.broadcast %19 : vector<16x1xf32> to vector<16x32xf32>
    %21 = arith.subf %15, %20 : vector<16x32xf32>
    %22 = arith.mulf %21, %21 : vector<16x32xf32>
    %cst_13 = arith.constant dense<0.000000e+00> : vector<16xf32>
    %23 = vector.multi_reduction <add>, %22, %cst_13 [1] : vector<16x32xf32> to vector<16xf32>
    %24 = vector.shape_cast %23 : vector<16xf32> to vector<16x1xf32>
    %cst_14 = arith.constant 3.200000e+01 : f32
    %25 = vector.broadcast %cst_14 : f32 to vector<16x1xf32>
    %26 = arith.divf %24, %25 : vector<16x1xf32>
    %27 = vector.broadcast %19 : vector<16x1xf32> to vector<16x32xf32>
    %28 = arith.subf %15, %27 : vector<16x32xf32>
    %cst_15 = arith.constant 9.99999974E-6 : f32
    %29 = vector.broadcast %cst_15 : f32 to vector<16x1xf32>
    %30 = arith.addf %26, %29 : vector<16x1xf32>
    %31 = math.rsqrt %30 : vector<16x1xf32>
    %32 = vector.broadcast %31 : vector<16x1xf32> to vector<16x32xf32>
    %33 = arith.mulf %28, %32 : vector<16x32xf32>
    %c0_16 = arith.constant 0 : index
    %c0_17 = arith.constant 0 : index
    %34 = vector.load %arg6[%c0_16, %c0_17] : memref<1x32xf32, #tpu.memory_space<vmem>>, vector<1x32xf32>
    %35 = vector.broadcast %34 : vector<1x32xf32> to vector<16x32xf32>
    %36 = arith.mulf %33, %35 : vector<16x32xf32>
    %c0_18 = arith.constant 0 : index
    %c0_19 = arith.constant 0 : index
    %37 = vector.load %arg7[%c0_18, %c0_19] : memref<1x32xf32, #tpu.memory_space<vmem>>, vector<1x32xf32>
    %38 = vector.broadcast %37 : vector<1x32xf32> to vector<16x32xf32>
    %39 = arith.addf %36, %38 : vector<16x32xf32>
    %c0_20 = arith.constant 0 : index
    %c0_21 = arith.constant 0 : index
    %40 = vector.load %arg8[%c0_20, %c0_21] : memref<16x32xf32, #tpu.memory_space<vmem>>, vector<16x32xf32>
    tpu.vector_store %arg8[%c0_20, %c0_21], %39 {strides = array<i32>} : memref<16x32xf32, #tpu.memory_space<vmem>>, vector<16x32xf32>,
    return
  }
  func.func @transform_0(%arg0: i32) -> (i32, i32) {
    %c0_i32 = arith.constant 0 : i32
    %c0_i32_0 = arith.constant 0 : i32
    return %arg0, %c0_i32 : i32, i32
  }
  func.func @transform_1(%arg0: i32) -> (i32, i32) {
    %c0_i32 = arith.constant 0 : i32
    %c0_i32_0 = arith.constant 0 : i32
    %c0_i32_1 = arith.constant 0 : i32
    return %c0_i32, %c0_i32_0 : i32, i32
  }
  func.func @transform_2(%arg0: i32) -> (i32, i32) {
    %c0_i32 = arith.constant 0 : i32
    %c0_i32_0 = arith.constant 0 : i32
    %c0_i32_1 = arith.constant 0 : i32
    return %c0_i32, %c0_i32_0 : i32, i32
  }
  func.func @transform_3(%arg0: i32) -> (i32, i32) {
    %c0_i32 = arith.constant 0 : i32
    %c0_i32_0 = arith.constant 0 : i32
    %c0_i32_1 = arith.constant 0 : i32
    return %c0_i32, %c0_i32_0 : i32, i32
  }
  func.func @transform_4(%arg0: i32) -> (i32, i32) {
    %c0_i32 = arith.constant 0 : i32
    %c0_i32_0 = arith.constant 0 : i32
    %c0_i32_1 = arith.constant 0 : i32
    return %c0_i32, %c0_i32_0 : i32, i32
  }
  func.func @transform_5(%arg0: i32) -> (i32, i32) {
    %c0_i32 = arith.constant 0 : i32
    %c0_i32_0 = arith.constant 0 : i32
    %c0_i32_1 = arith.constant 0 : i32
    return %c0_i32, %c0_i32_0 : i32, i32
  }
  func.func @transform_6(%arg0: i32) -> (i32, i32) {
    %c0_i32 = arith.constant 0 : i32
    %c0_i32_0 = arith.constant 0 : i32
    %c0_i32_1 = arith.constant 0 : i32
    return %c0_i32, %c0_i32_0 : i32, i32
  }
  func.func @transform_7(%arg0: i32) -> (i32, i32) {
    %c0_i32 = arith.constant 0 : i32
    %c0_i32_0 = arith.constant 0 : i32
    return %arg0, %c0_i32 : i32, i32
  }
}

</mosaic_0001>

<bundles_post_ra>
// kernel: decoder_forward.11
= control target key start
LH: loop header
LB: loop body
LE: loop exit
PB: predicated region body
PF: predicated region fallthrough
CT: control target
= control target key end

     0   :  { %s658_s21 = smov 0   ;;  %s660_s22 = smov 0   ;;  %s726_s0 = inlined_call_operand.vmem [shape: bf16[2,4,8,8], index: 0, kind: input, shape index: {}]   ;;  %s727_s1 = inlined_call_operand.vmem [shape: f32[2,8,32], index: 1, kind: input, shape index: {}]   ;;  %s728_s2 = inlined_call_operand.vmem [shape: bf16[4,8,32], index: 2, kind: input, shape index: {}]   ;;  %s729_s3 = inlined_call_operand.vmem [shape: f32[1,32], index: 3, kind: input, shape index: {}]   ;;  %s730_s4 = inlined_call_operand.vmem [shape: f32[1,32], index: 4, kind: input, shape index: {}]   ;;  %s731_s5 = inlined_call_operand.vmem [shape: f32[1,32], index: 5, kind: input, shape index: {}]   ;;  %s732_s6 = inlined_call_operand.vmem [shape: f32[2,8,32], index: 6, kind: output, shape index: {}]  }
   0x1   :  { %s662_s23 = smov 0  }
   0x2 LB: > { %s28_s24 = sadd.s32 1, %s616_s22  ;;  %p548_p0 = scmp.ge.s32.totalorder %s620_s23, 1  ;;  %s620_s23 = sphi %s662_s23, %s16_s23   ;;  %s616_s22 = sphi %s660_s22, %s734_s22   ;;  %s612_s21 = sphi %s658_s21, %s733_s21  }
   0x3   : > { %p30_p1 = scmp.ge.s32.totalorder %s28_s24, 2  ;;  %p245_p2 = scmp.lt.s32.totalorder %s620_s23, 3 }
   0x5   : > { %s736_s24 = smov (%p30_p1, %s28_s24), 0  ;;  %p246_p3 = pnand %p548_p0, %p245_p2 }
   0x6   : > { %p287_p4 = scmp.lt.s32.totalorder (!%p246_p3), %s612_s21, 1 }
   0x7   : > { %249 = sbr.rel (%p246_p3) target bundleno = 427 (0x1ab), region = 44 }
   0xc   : > { %v554_v0 = vld [vmem:[%s728_s2 + $0x4] sm:$0xf]  ;;  %vm320_vm0 = vcmask 1043456   ;;  %v311_v1 = vld [vmem:[%s728_s2] sm:$0xf]  ;;  %s738_s21 = smov (!%p287_p4, %s612_s21), 1 }
   0xd   : > { %v322_v2 = vsel %vm320_vm0, %v554_v0, 0  ;;  %v341_v3 = vsel %vm320_vm0, %v311_v1, 0  ;;  %v558_v4 = vld [vmem:[%s728_s2 + $0x8] sm:$0xf]  ;;  %v561_v5 = vld [vmem:[%s728_s2 + $0xc] sm:$0xf] }
   0xe   : > { %331 = vmatpush.bf16.msra.mxu0 %v322_v2  ;;  %350 = vmatpush.bf16.msra.mxu1 %v341_v3  ;;  %v364_v6 = vsel %vm320_vm0, %v558_v4, 0  ;;  %v388_v7 = vsel %vm320_vm0, %v561_v5, 0  ;;  %s565_s9 = sshll.u32 %s738_s21, 4  ;;  %vm316_vm1 = vcmask 64512   ;;  %s551_s13 = sshll.u32 %s738_s21, 3  ;;  %vm411_vm2 = vcmask 261120  }
   0xf   : > { %373 = vmatpush.bf16.msra.mxu2 %v364_v6  ;;  %397 = vmatpush.bf16.msra.mxu3 %v388_v7  ;;  %s294_s12 = scalar_lea.vmem %s726_s0, %s565_s9  ;;  %s301_s16 = scalar_lea.vmem %s727_s1, %s551_s13  ;;  %v591_v22 = vld [vmem:[%s729_s3] ss:$0 sm:$0xff]  ;;  %v622_v28 = vmov 32.0  }
  0x10   : > { %v553_v8 = vld [vmem:[%s294_s12 + $0x4] sm:$0xf]  ;;  %v310_v9 = vld [vmem:[%s294_s12] sm:$0xf]  ;;  %v557_v10 = vld [vmem:[%s294_s12 + $0x8] sm:$0xf]  ;;  %594 = vrcp.f32 %v622_v28  ;;  %s308_s29 = scalar_lea.vmem %s732_s6, %s551_s13 }
  0x11   : > { %555 = vmatmul.msk.bf16.vlgmr.msra.gmra.mxu0 %vm316_vm1, %v553_v8  ;;  %556 = vmatmul.msk.bf16.vlgmr.msra.gmra.mxu1 %vm316_vm1, %v310_v9  ;;  %v560_v11 = vld [vmem:[%s294_s12 + $0xc] sm:$0xf]  ;;  %v404_v20 = vld [vmem:[%s301_s16] sm:$0xff] }
  0x12   : > { %559 = vmatmul.msk.bf16.vlgmr.msra.gmra.mxu2 %vm316_vm1, %v557_v10  ;;  %562 = vmatmul.msk.bf16.vlgmr.msra.gmra.mxu3 %vm316_vm1, %v560_v11  ;;  %v592_v49 = vld [vmem:[%s730_s4] ss:$0 sm:$0xff] }
  0x13   : > { %v593_v51 = vld [vmem:[%s731_s5] ss:$0 sm:$0xff] }
  0x16   : > { %v595_v29 = vpop.eup %594 }
  0x17   : > { %v416_v30 = vmul.f32 32.0, %v595_v29  ;;  %vm420_vm3 = vweird.f32 %v595_v29 }
  0x19   : > { %v417_v31 = vsub.f32 1.0, %v416_v30 }
  0x1b   : > { %v418_v32 = vmul.f32 %v595_v29, %v417_v31 }
  0x1d   : > { %v419_v33 = vadd.f32 %v595_v29, %v418_v32 }
  0x1f   : > { %v421_v34 = vsel %vm420_vm3, %v595_v29, %v419_v33 }
  0x8e   : > { %v333_v12 = vpop.f32.mrf.mxu0  ;;  %v352_v13 = vpop.f32.mrf.mxu1 }
  0x8f   : > { %v353_v14 = vadd.f32 %v352_v13, %v333_v12 }
  0x95   : > { %v375_v15 = vpop.f32.mrf.mxu2  ;;  %v399_v16 = vpop.f32.mrf.mxu3 }
  0x96   : > { %v379_v17 = vadd.f32 %v375_v15, %v353_v14  ;;  %v335_v18 = vpop.f32.mrf.mxu0  ;;  %v354_v19 = vpop.f32.mrf.mxu1 }
  0x98   : > { %v403_v21 = vadd.f32 %v399_v16, %v379_v17 }
  0x9a   : > { %v405_v23 = vadd.f32 %v404_v20, %v403_v21 }
  0x9c   : > { %v410_v24 = vadd.f32 %v591_v22, %v405_v23 }
  0x9d   : > { %v377_v25 = vpop.f32.mrf.mxu2  ;;  %v401_v26 = vpop.f32.mrf.mxu3 }
  0x9e   : > { %v412_v27 = vsel %vm411_vm2, %v410_v24, 0.0 }
  0x9f   : > { %413 = vadd.xlane.f32.xlu0 %v412_v27 }
 0x112   : > { %v414_v35 = vpop.xlane.xlu0 %413 }
 0x113   : > { %v422_v36 = vmul.f32 %v421_v34, %v414_v35 }
 0x115   : > { %v423_v37 = vsub.f32 %v410_v24, %v422_v36 }
 0x117   : > { %v424_v38 = vmul.f32 %v423_v37, %v423_v37 }
 0x119   : > { %v425_v39 = vsel %vm411_vm2, %v424_v38, 0.0 }
 0x11a   : > { %426 = vadd.xlane.f32.xlu0 %v425_v39 }
 0x18d   : > { %v427_v40 = vpop.xlane.xlu0 %426 }
 0x18e   : > { %v428_v41 = vmul.f32 %v427_v40, %v421_v34 }
 0x190   : > { %v429_v42 = vadd.f32 1e-05, %v428_v41 }
 0x192   : > { %596 = vrsqrt.f32 %v429_v42  ;;  %vm436_vm5 = vweird.f32 %v429_v42 }
 0x198   : > { %v597_v43 = vpop.eup %596 }
 0x199   : > { %v431_v44 = vmul.f32 %v597_v43, %v429_v42  ;;  %vm437_vm4 = vweird.f32 %v597_v43 }
 0x19a   : > { %vm438_vm6 = vmor %vm436_vm5, %vm437_vm4 }
 0x19b   : > { %v432_v45 = vmul.f32 %v597_v43, %v431_v44 }
 0x19d   : > { %v433_v46 = vmul.f32 0.5, %v432_v45 }
 0x19f   : > { %v434_v47 = vsub.f32 1.5, %v433_v46 }
 0x1a1   : > { %v435_v48 = vmul.f32 %v597_v43, %v434_v47 }
 0x1a3   : > { %v439_v50 = vsel %vm438_vm6, %v597_v43, %v435_v48 }
 0x1a4   : > { %v440_v52 = vmul.f32 %v439_v50, %v423_v37 }
 0x1a6   : > { %v445_v53 = vmul.f32 %v592_v49, %v440_v52 }
 0x1a8   : > { %v450_v54 = vadd.f32 %v593_v51, %v445_v53 }
 0x1aa   : > { %451 = vst.msk [vmem:[%s308_s29] sm:$0xff] %vm411_vm2, %v450_v54 }
 0x1ab PF: > { %s16_s23 = sadd.s32 1, %s620_s23   ;;  %s733_s21 = smov %s616_s22 }
 0x1ac   : > { %p13_p5 = scmp.ge.s32.totalorder %s16_s23, 4   ;;  %s734_s22 = smov %s736_s24 }
 0x1ae   :  { %15 = sbr.rel (!%p13_p5) target bundleno = 2 (0x2), region = 83 }

// kernel: decoder_forward.10
= control target key start
LH: loop header
LB: loop body
LE: loop exit
PB: predicated region body
PF: predicated region fallthrough
CT: control target
= control target key end

     0   :  { %s957_s27 = smov 0   ;;  %s959_s28 = smov 0   ;;  %s1046_s0 = inlined_call_operand.vmem [shape: f32[2,8,32], index: 0, kind: input, shape index: {}]   ;;  %s1047_s1 = inlined_call_operand.vmem [shape: bf16[4,32,8], index: 1, kind: input, shape index: {}]   ;;  %s1048_s2 = inlined_call_operand.vmem [shape: f32[4,1,8], index: 2, kind: input, shape index: {}]   ;;  %s1049_s3 = inlined_call_operand.vmem [shape: bf16[4,32,8], index: 3, kind: input, shape index: {}]   ;;  %s1050_s4 = inlined_call_operand.vmem [shape: f32[4,1,8], index: 4, kind: input, shape index: {}]   ;;  %s1051_s5 = inlined_call_operand.vmem [shape: bf16[4,32,8], index: 5, kind: input, shape index: {}]   ;;  %s1052_s6 = inlined_call_operand.vmem [shape: f32[4,1,8], index: 6, kind: input, shape index: {}]   ;;  %s1053_s7 = inlined_call_operand.vmem [shape: f32[2,1,8], index: 7, kind: input, shape index: {}]   ;;  %s1054_s8 = inlined_call_operand.vmem [shape: bf16[2,4,8,8], index: 8, kind: output, shape index: {}]  }
   0x1   :  { %s961_s29 = smov 0   ;;  %s963_s30 = smov 0  }
   0x2   :  { %s965_s9 = smov 0  }
   0x3 LB: > { %s27_s10 = sadd.s32 1, %s900_s29  ;;  %s30_s11 = sadd.s32 1, %s904_s30  ;;  %s908_s9 = sphi %s965_s9, %s18_s9   ;;  %s904_s30 = sphi %s963_s30, %s1058_s30   ;;  %s900_s29 = sphi %s961_s29, %s1057_s29   ;;  %s896_s28 = sphi %s959_s28, %s1056_s28   ;;  %s892_s27 = sphi %s957_s27, %s1055_s27  }
   0x4   : > { %p28_p0 = scmp.ge.s32.totalorder %s27_s10, 4  ;;  %p771_p1 = scmp.ge.s32.totalorder %s908_s9, 1 }
   0x5   : > { %p337_p2 = scmp.lt.s32.totalorder %s908_s9, 9 }
   0x6   : > { %s1060_s10 = smov (%p28_p0, %s27_s10), 0  ;;  %s1062_s11 = smov (!%p28_p0, %s30_s11), %s904_s30 }
   0x7   : > { %p338_p3 = pnand %p771_p1, %p337_p2  ;;  %p32_p4 = scmp.ge.s32.totalorder %s1062_s11, 2 }
   0x8   : > { %p404_p5 = scmp.lt.s32.totalorder (!%p338_p3), %s892_s27, 3  ;;  %p400_p6 = scmp.lt.s32.totalorder (!%p338_p3), %s896_s28, 1 }
   0x9   : > { %s1064_s11 = smov (%p32_p4, %s1062_s11), 0  ;;  %341 = sbr.rel (%p338_p3) target bundleno = 562 (0x232), region = 52 }
   0xe   : > { %s1066_s27 = smov (!%p404_p5, %s892_s27), 3  ;;  %s1068_s28 = smov (!%p400_p6, %s896_s28), 1  ;;  %vm462_vm0 = vcmask 261120   ;;  %vm559_vm1 = vcmask 64512   ;;  %vm593_vm2 = vcmask 1043456   ;;  %v545_v25 = vlaneseq }
   0xf   : > { %s812_s12 = sshll.u32 %s1066_s27, 4  ;;  %s411_s15 = scalar_lea.vmem %s1048_s2, %s1066_s27  ;;  %v910_v26 = vmov 0   ;;  %v911_v32 = vmov -1e+09   ;;  %vm613_vm7 = vcmask 60416  }
  0x10   : > { %s408_s18 = scalar_lea.vmem %s1047_s1, %s812_s12  ;;  %s416_s21 = scalar_lea.vmem %s1049_s3, %s812_s12  ;;  %v863_v11 = vld [vmem:[%s411_s15] ss:$0 sm:$0xff]  ;;  %v546_v29 = vshrl.u32 %v545_v25, 7  ;;  %v548_v30 = vand.u32 127, %v545_v25 }
  0x11   : > { %v816_v0 = vld [vmem:[%s408_s18 + $0x8] sm:$0xff]  ;;  %s772_s22 = sshll.u32 %s1068_s28, 3  ;;  %v815_v2 = vld [vmem:[%s408_s18] sm:$0xff]  ;;  %s419_s14 = scalar_lea.vmem %s1050_s4, %s1066_s27 }
  0x12   : > { %v818_v1 = vld [vmem:[%s416_s21 + $0x8] sm:$0xff]  ;;  %s403_s25 = scalar_lea.vmem %s1046_s0, %s772_s22  ;;  %472 = vmatpush.bf16.msra.mxu0 %v816_v0  ;;  %v817_v3 = vld [vmem:[%s416_s21] sm:$0xff]  ;;  %s424_s19 = scalar_lea.vmem %s1051_s5, %s812_s12  ;;  %vm549_vm4 = vcmp.ge.s32.totalorder %v546_v29, %v548_v30 }
  0x13   : > { %505 = vmatpush.bf16.msra.mxu1 %v818_v1  ;;  %v440_v4 = vld [vmem:[%s403_s25] sm:$0xff]  ;;  %v820_v6 = vld [vmem:[%s424_s19 + $0x8] sm:$0xff]  ;;  %s427_s20 = scalar_lea.vmem %s1052_s6, %s1066_s27  ;;  %s430_s15 = scalar_lea.vmem %s1053_s7, %s1068_s28 }
  0x14   : > { %v441_v5 = vpack.c.bf16 %v440_v4, %v440_v4  ;;  %538 = vmatpush.bf16.msra.mxu2 %v820_v6  ;;  %v819_v7 = vld [vmem:[%s424_s19] sm:$0xff]  ;;  %s779_s23 = sshll.u32 %s1068_s28, 2 }
  0x15   : > { %v864_v8 = vld [vmem:[%s419_s14] ss:$0 sm:$0xff]  ;;  %s436_s24 = sadd.s32 %s779_s23, %s1066_s27 }
  0x16   : > { %473 = vmatpush.bf16.msra.mxu0 %v815_v2  ;;  %v865_v19 = vld [vmem:[%s427_s20] ss:$0 sm:$0xff]  ;;  %s780_s25 = sshll.u32 %s436_s24, 2 }
  0x17   : > { %506 = vmatpush.bf16.msra.mxu1 %v817_v3  ;;  %v550_v22 = vld [vmem:[%s430_s15] sm:$0x1]  ;;  %s438_s14 = scalar_lea.vmem %s1054_s8, %s780_s25 }
  0x18   : > { %539 = vmatpush.bf16.msra.mxu2 %v819_v7  ;;  %vm551_vm3 = vcmp.gt.f32.partialorder %v550_v22, 0.5 }
  0x19   : > { %789 = vmatmul.msk.bf16.vlgmr.msra.gmra.mxu0 %vm462_vm0, %v441_v5  ;;  %v552_v27 = vsel %vm551_vm3, 1, %v910_v26 }
  0x1a   : > { %798 = vmatmul.msk.bf16.vlgmr.msra.gmra.mxu1 %vm462_vm0, %v441_v5  ;;  %v553_v31 = vperm.slane %v552_v27, 0 }
  0x1b   : > { %807 = vmatmul.msk.bf16.vlgmr.msra.gmra.mxu2 %vm462_vm0, %v441_v5 }
  0x1c   : > { %vm554_vm5 = vcmp.eq.s32.totalorder %v553_v31, 1 }
  0x1d   : > { %vm555_vm6 = vmand %vm549_vm4, %vm554_vm5 }
  0x1e   : > { %v556_v33 = vsel %vm555_vm6, 0.0, %v911_v32 }
  0x96   : > { %v475_v9 = vpop.f32.mrf.mxu0 }
  0x97   : > { %v508_v10 = vpop.f32.mrf.mxu1  ;;  %v476_v14 = vadd.f32 %v863_v11, %v475_v9 }
  0x98   : > { %v509_v12 = vadd.f32 %v864_v8, %v508_v10 }
  0x99   : > { %v557_v18 = vpack.c.bf16 %v476_v14, %v476_v14 }
  0x9a   : > { %v558_v13 = vpack.c.bf16 %v509_v12, %v509_v12 }
  0x9c   : > { %v564_v15 = vsel %vm559_vm1, %v558_v13, 0 }
  0x9d   : > { %573 = vmatpush.bf16.xpose.msra.mxu3 %v564_v15 }
  0x9e   : > { %v477_v16 = vpop.f32.mrf.mxu0  ;;  %v541_v20 = vpop.f32.mrf.mxu2 }
  0x9f   : > { %v510_v17 = vpop.f32.mrf.mxu1  ;;  %v542_v21 = vadd.f32 %v865_v19, %v541_v20 }
  0xa1   : > { %v589_v23 = vpack.c.bf16 %v542_v21, %v542_v21 }
  0xa3   : > { %v595_v24 = vsel %vm593_vm2, %v589_v23, 0 }
  0xa4   : > { %808 = vmatmul.msk.bf16.vlgmr.msra.gmra.mxu3 %vm559_vm1, %v557_v18  ;;  %604 = vmatpush.bf16.msrb.mxu0 %v595_v24 }
  0xa6   : > { %v543_v28 = vpop.f32.mrf.mxu2 }
 0x127   : > { %v575_v34 = vpop.f32.mrf.mxu3 }
 0x128   : > { %v576_v35 = vadd.f32 %v575_v34, %v556_v33 }
 0x12a   : > { %v579_v36 = vsel %vm559_vm1, %v576_v35, -inf }
 0x12b   : > { %580 = vmax.xlane.f32.xlu0 %v579_v36 }
 0x12f   : > { %v577_v37 = vpop.f32.mrf.mxu3 }
 0x19e   : > { %v581_v38 = vpop.xlane.xlu0 %580 }
 0x19f   : > { %v582_v39 = vsub.f32 %v576_v35, %v581_v38 }
 0x1a1   : > { %v583_v40 = vmul.f32 1.442695, %v582_v39 }
 0x1a3   : > { %866 = vpow2.f32 %v583_v40 }
 0x1a9   : > { %v867_v41 = vpop.eup %866 }
 0x1aa   : > { %v585_v42 = vsel %vm559_vm1, %v867_v41, 0.0  ;;  %v588_v43 = vpack.c.bf16 %v867_v41, %v867_v41 }
 0x1ab   : > { %586 = vadd.xlane.f32.xlu0 %v585_v42 }
 0x1ac   : > { %809 = vmatmul.msk.bf16.vlgmr.msrb.gmra.mxu0 %vm559_vm1, %v588_v43 }
 0x21e   : > { %v587_v44 = vpop.xlane.xlu0 %586 }
 0x21f   : > { %868 = vrcp.f32 %v587_v44 }
 0x225   : > { %v869_v45 = vpop.eup %868 }
 0x229   : > { %v606_v46 = vpop.f32.mrf.mxu0 }
 0x22a   : > { %v611_v47 = vmul.f32 %v869_v45, %v606_v46 }
 0x22c   : > { %v612_v48 = vpack.c.bf16 %v611_v47, %v611_v47 }
 0x22e   : > { %614 = vst.msk [vmem:[%s438_s14] sm:$0xf] %vm613_vm7, %v612_v48 }
 0x231   : > { %v608_v49 = vpop.f32.mrf.mxu0 }
 0x232 PF: > { %s18_s9 = sadd.s32 1, %s908_s9   ;;  %s1055_s27 = smov %s900_s29 }
 0x233   : > { %p15_p7 = scmp.ge.s32.totalorder %s18_s9, 10   ;;  %s1056_s28 = smov %s904_s30 }
 0x234   : > { %s1057_s29 = smov %s1060_s10  ;;  %s1058_s30 = smov %s1064_s11 }
 0x235   :  { %17 = sbr.rel (!%p15_p7) target bundleno = 3 (0x3), region = 103 }

// kernel: decoder_forward.12
= control target key start
LH: loop header
LB: loop body
LE: loop exit
PB: predicated region body
PF: predicated region fallthrough
CT: control target
= control target key end

     0   :  { %s1025_s30 = smov 0   ;;  %s1027_s10 = smov 0   ;;  %s1118_s0 = inlined_call_operand.vmem [shape: f32[2,8,32], index: 0, kind: input, shape index: {}]   ;;  %s1119_s1 = inlined_call_operand.vmem [shape: f32[2,12,32], index: 1, kind: input, shape index: {}]   ;;  %s1120_s2 = inlined_call_operand.vmem [shape: bf16[4,32,8], index: 2, kind: input, shape index: {}]   ;;  %s1121_s3 = inlined_call_operand.vmem [shape: f32[4,1,8], index: 3, kind: input, shape index: {}]   ;;  %s1122_s4 = inlined_call_operand.vmem [shape: bf16[4,32,8], index: 4, kind: input, shape index: {}]   ;;  %s1123_s5 = inlined_call_operand.vmem [shape: f32[4,1,8], index: 5, kind: input, shape index: {}]   ;;  %s1124_s6 = inlined_call_operand.vmem [shape: bf16[4,32,8], index: 6, kind: input, shape index: {}]   ;;  %s1125_s7 = inlined_call_operand.vmem [shape: f32[4,1,8], index: 7, kind: input, shape index: {}]   ;;  %s1126_s8 = inlined_call_operand.vmem [shape: f32[2,1,12], index: 8, kind: input, shape index: {}]   ;;  %s1127_s9 = inlined_call_operand.vmem [shape: bf16[2,4,8,8], index: 9, kind: output, shape index: {}]  }
   0x1   :  { %s1029_s11 = smov 0   ;;  %s1031_s12 = smov 0  }
   0x2   :  { %s1033_s13 = smov 0  }
   0x3 LB: > { %s28_s14 = sadd.s32 1, %s964_s11  ;;  %s31_s15 = sadd.s32 1, %s968_s12  ;;  %s972_s13 = sphi %s1033_s13, %s19_s13   ;;  %s968_s12 = sphi %s1031_s12, %s1133_s12   ;;  %s964_s11 = sphi %s1029_s11, %s1132_s11   ;;  %s960_s10 = sphi %s1027_s10, %s1131_s10   ;;  %s956_s30 = sphi %s1025_s30, %s1130_s30  }
   0x4   : > { %p29_p0 = scmp.ge.s32.totalorder %s28_s14, 4  ;;  %p833_p1 = scmp.ge.s32.totalorder %s972_s13, 1 }
   0x5   : > { %p372_p2 = scmp.lt.s32.totalorder %s972_s13, 9 }
   0x6   : > { %s1135_s14 = smov (%p29_p0, %s28_s14), 0  ;;  %s1137_s15 = smov (!%p29_p0, %s31_s15), %s968_s12 }
   0x7   : > { %p373_p3 = pnand %p833_p1, %p372_p2  ;;  %p33_p4 = scmp.ge.s32.totalorder %s1137_s15, 2 }
   0x8   : > { %p451_p5 = scmp.lt.s32.totalorder (!%p373_p3), %s956_s30, 3  ;;  %p442_p6 = scmp.lt.s32.totalorder (!%p373_p3), %s960_s10, 1 }
   0x9   : > { %s1139_s15 = smov (%p33_p4, %s1137_s15), 0  ;;  %376 = sbr.rel (%p373_p3) target bundleno = 569 (0x239), region = 56 }
   0xa   : > { %1128 = sst [smem:[#allocation2_spill]] %s1139_s15 }
   0xe   : > { %s1141_s30 = smov (!%p451_p5, %s956_s30), 3  ;;  %s1143_s10 = smov (!%p442_p6, %s960_s10), 1  ;;  %vm512_vm0 = vcmask 261120   ;;  %vm608_vm1 = vcmask 64512   ;;  %vm643_vm2 = vcmask 1045504   ;;  %vm628_vm4 = vcmask 97280  }
   0xf   : > { %s877_s16 = sshll.u32 %s1141_s30, 4  ;;  %s466_s19 = scalar_lea.vmem %s1123_s5, %s1141_s30  ;;  %v974_v31 = vmov -1e+09   ;;  %vm663_vm5 = vcmask 60416  }
  0x10   : > { %s463_s22 = scalar_lea.vmem %s1122_s4, %s877_s16  ;;  %s876_s23 = sshll.u32 %s1143_s10, 4  ;;  %v927_v13 = vld [vmem:[%s466_s19] ss:$0 sm:$0xff] }
  0x11   : > { %v883_v0 = vld [vmem:[%s463_s22 + $0x8] sm:$0xff]  ;;  %s450_s26 = scalar_lea.vmem %s1119_s1, %s876_s23  ;;  %s455_s29 = scalar_lea.vmem %s1120_s2, %s877_s16  ;;  %v882_v2 = vld [vmem:[%s463_s22] sm:$0xff] }
  0x12   : > { %v881_v1 = vld [vmem:[%s455_s29 + $0x8] sm:$0xff]  ;;  %s834_s15 = sshll.u32 %s1143_s10, 3  ;;  %558 = vmatpush.bf16.msra.mxu1 %v883_v0  ;;  %v489_v3 = vld [vmem:[%s450_s26] sm:$0xff]  ;;  %s458_s24 = scalar_lea.vmem %s1121_s3, %s1141_s30 }
  0x13   : > { %v490_v4 = vld [vmem:[%s450_s26 + $0x8] sm:$0xf]  ;;  %s445_s20 = scalar_lea.vmem %s1118_s0, %s834_s15  ;;  %522 = vmatpush.bf16.msra.mxu0 %v881_v1  ;;  %v880_v5 = vld [vmem:[%s455_s29] sm:$0xff]  ;;  %s471_s26 = scalar_lea.vmem %s1124_s6, %s877_s16 }
  0x14   : > { %v487_v6 = vld [vmem:[%s445_s20] sm:$0xff]  ;;  %v491_v7 = vpack.c.bf16 %v490_v4, %v489_v3  ;;  %v885_v9 = vld [vmem:[%s471_s26 + $0x8] sm:$0xff]  ;;  %s474_s29 = scalar_lea.vmem %s1125_s7, %s1141_s30  ;;  %s477_s18 = scalar_lea.vmem %s1126_s8, %s1143_s10 }
  0x15   : > { %v488_v8 = vpack.c.bf16 %v487_v6, %v487_v6  ;;  %592 = vmatpush.bf16.msra.mxu2 %v885_v9  ;;  %v884_v10 = vld [vmem:[%s471_s26] sm:$0xff]  ;;  %s843_s20 = sshll.u32 %s1143_s10, 2 }
  0x16   : > { %559 = vmatpush.bf16.msra.mxu1 %v882_v2  ;;  %v928_v16 = vld [vmem:[%s458_s24] ss:$0 sm:$0xff]  ;;  %s483_s21 = sadd.s32 %s843_s20, %s1141_s30 }
  0x17   : > { %523 = vmatpush.bf16.msra.mxu0 %v880_v5  ;;  %v929_v24 = vld [vmem:[%s474_s29] ss:$0 sm:$0xff]  ;;  %s844_s23 = sshll.u32 %s483_s21, 2 }
  0x18   : > { %v600_v28 = vld [vmem:[%s477_s18] sm:$0x1]  ;;  %s485_s25 = scalar_lea.vmem %s1127_s9, %s844_s23 }
  0x19   : > { %862 = vmatmul.msk.bf16.vlgmr.msra.gmra.mxu1 %vm512_vm0, %v491_v7  ;;  %593 = vmatpush.bf16.msra.mxu2 %v884_v10  ;;  %vm601_vm3 = vcmp.gt.f32.partialorder %v600_v28, 0.5 }
  0x1a   : > { %853 = vmatmul.msk.bf16.vlgmr.msra.gmra.mxu0 %vm512_vm0, %v488_v8  ;;  %v602_v32 = vsel %vm601_vm3, 0.0, %v974_v31 }
  0x1b   : > { %v606_v33 = vperm.slane %v602_v32, 0 }
  0x1c   : > { %871 = vmatmul.msk.bf16.vlgmr.msra.gmra.mxu2 %vm512_vm0, %v491_v7 }
  0x96   : > { %v561_v11 = vpop.f32.mrf.mxu1 }
  0x97   : > { %v525_v12 = vpop.f32.mrf.mxu0  ;;  %v562_v15 = vadd.f32 %v927_v13, %v561_v11 }
  0x98   : > { %v526_v20 = vadd.f32 %v928_v16, %v525_v12 }
  0x9a   : > { %v603_v22 = vpack.c.bf16 %v526_v20, %v526_v20 }
  0x9e   : > { %v563_v14 = vpop.f32.mrf.mxu1 }
  0x9f   : > { %v564_v17 = vadd.f32 %v927_v13, %v563_v14  ;;  %v527_v18 = vpop.f32.mrf.mxu0  ;;  %v595_v23 = vpop.f32.mrf.mxu2 }
  0xa0   : > { %v596_v25 = vadd.f32 %v929_v24, %v595_v23 }
  0xa1   : > { %v604_v19 = vpack.c.bf16 %v564_v17, %v562_v15 }
  0xa3   : > { %v613_v21 = vsel %vm608_vm1, %v604_v19, 0 }
  0xa4   : > { %622 = vmatpush.bf16.xpose.msra.mxu3 %v613_v21 }
  0xa7   : > { %v597_v26 = vpop.f32.mrf.mxu2 }
  0xa8   : > { %v598_v27 = vadd.f32 %v929_v24, %v597_v26 }
  0xaa   : > { %v639_v29 = vpack.c.bf16 %v598_v27, %v596_v25 }
  0xab   : > { %872 = vmatmul.msk.bf16.vlgmr.msra.gmra.mxu3 %vm608_vm1, %v603_v22 }
  0xac   : > { %v645_v30 = vsel %vm643_vm2, %v639_v29, 0 }
  0xad   : > { %654 = vmatpush.bf16.msrb.mxu0 %v645_v30 }
 0x12e   : > { %v624_v34 = vpop.f32.mrf.mxu3 }
 0x12f   : > { %v625_v35 = vadd.f32 %v624_v34, %v606_v33 }
 0x131   : > { %v629_v36 = vsel %vm628_vm4, %v625_v35, -inf }
 0x132   : > { %630 = vmax.xlane.f32.xlu0 %v629_v36 }
 0x136   : > { %v626_v37 = vpop.f32.mrf.mxu3 }
 0x1a5   : > { %v631_v38 = vpop.xlane.xlu0 %630 }
 0x1a6   : > { %v632_v39 = vsub.f32 %v625_v35, %v631_v38 }
 0x1a8   : > { %v633_v40 = vmul.f32 1.442695, %v632_v39 }
 0x1aa   : > { %930 = vpow2.f32 %v633_v40 }
 0x1b0   : > { %v931_v41 = vpop.eup %930 }
 0x1b1   : > { %v635_v42 = vsel %vm628_vm4, %v931_v41, 0.0  ;;  %v638_v43 = vpack.c.bf16 %v931_v41, %v931_v41 }
 0x1b2   : > { %636 = vadd.xlane.f32.xlu0 %v635_v42 }
 0x1b3   : > { %873 = vmatmul.msk.bf16.vlgmr.msrb.gmra.mxu0 %vm628_vm4, %v638_v43 }
 0x225   : > { %v637_v44 = vpop.xlane.xlu0 %636 }
 0x226   : > { %932 = vrcp.f32 %v637_v44 }
 0x22c   : > { %v933_v45 = vpop.eup %932 }
 0x230   : > { %v656_v46 = vpop.f32.mrf.mxu0 }
 0x231   : > { %v661_v47 = vmul.f32 %v933_v45, %v656_v46 }
 0x233   : > { %v662_v48 = vpack.c.bf16 %v661_v47, %v661_v47 }
 0x235   : > { %664 = vst.msk [vmem:[%s485_s25] sm:$0xf] %vm663_vm5, %v662_v48 }
 0x238   : > { %v658_v49 = vpop.f32.mrf.mxu0 }
 0x239 PF: > { %s19_s13 = sadd.s32 1, %s972_s13   ;;  %s1129_s26 = sld [smem:[#allocation2_spill]] }
 0x23a   : > { %p16_p7 = scmp.ge.s32.totalorder %s19_s13, 10   ;;  %s1130_s30 = smov %s964_s11 }
 0x23b   : > { %s1131_s10 = smov %s968_s12  ;;  %s1132_s11 = smov %s1135_s14 }
 0x23c   :  { %18 = sbr.rel (!%p16_p7) target bundleno = 3 (0x3), region = 110 }
 0x23f   : > { %s1133_s12 = smov %s1129_s26 }

// kernel: decoder_forward.14
= control target key start
LH: loop header
LB: loop body
LE: loop exit
PB: predicated region body
PF: predicated region fallthrough
CT: control target
= control target key end

     0   :  { %vm50_vm0 = vcmask 261120   ;;  %vm107_vm1 = vcmask 523264   ;;  %v239_v26 = vmov 32.0   ;;  %s329_s1 = inlined_call_operand.vmem [shape: bf16[32,64], index: 1, kind: input, shape index: {}]   ;;  %s330_s0 = inlined_call_operand.vmem [shape: f32[16,32], index: 0, kind: input, shape index: {}]   ;;  %s331_s2 = inlined_call_operand.vmem [shape: f32[1,64], index: 2, kind: input, shape index: {}]   ;;  %s332_s4 = inlined_call_operand.vmem [shape: f32[1,32], index: 4, kind: input, shape index: {}]   ;;  %s333_s3 = inlined_call_operand.vmem [shape: bf16[64,32], index: 3, kind: input, shape index: {}]   ;;  %s334_s5 = inlined_call_operand.vmem [shape: f32[1,32], index: 5, kind: input, shape index: {}]   ;;  %s335_s6 = inlined_call_operand.vmem [shape: f32[1,32], index: 6, kind: input, shape index: {}]   ;;  %s336_s7 = inlined_call_operand.vmem [shape: f32[16,32], index: 7, kind: output, shape index: {}]  }
   0x1   :  { %v223_v0 = vld [vmem:[%s329_s1 + $0x8] sm:$0xff]  ;;  %v222_v1 = vld [vmem:[%s329_s1] sm:$0xff]  ;;  %v227_v5 = vld [vmem:[%s333_s3 + $0x18] sm:$0xff]  ;;  %233 = vrcp.f32 %v239_v26 }
   0x2   :  { %60 = vmatpush.bf16.msra.mxu0 %v223_v0  ;;  %v27_v2 = vld [vmem:[%s330_s0] sm:$0xff]  ;;  %v28_v3 = vld [vmem:[%s330_s0 + $0x8] sm:$0xff]  ;;  %115 = vmatpush.bf16.msra.mxu1 %v227_v5  ;;  %v226_v6 = vld [vmem:[%s333_s3 + $0x10] sm:$0xff] }
   0x3   :  { %v29_v4 = vpack.c.bf16 %v28_v3, %v27_v2  ;;  %v225_v7 = vld [vmem:[%s333_s3 + $0x8] sm:$0xff]  ;;  %v224_v8 = vld [vmem:[%s333_s3] sm:$0xff] }
   0x4   :  { %v229_v10 = vld [vmem:[%s331_s2] ss:$0 sm:$0xff] }
   0x5   :  { %v230_v17 = vld [vmem:[%s332_s4] ss:$0 sm:$0xff] }
   0x6   :  { %61 = vmatpush.bf16.msra.mxu0 %v222_v1  ;;  %116 = vmatpush.bf16.msra.mxu1 %v226_v6  ;;  %v231_v57 = vld [vmem:[%s334_s5] ss:$0 sm:$0xff] }
   0x7   :  { %v234_v27 = vpop.eup %233  ;;  %v232_v60 = vld [vmem:[%s335_s6] ss:$0 sm:$0xff] }
   0x8   :  { %v134_v28 = vmul.f32 32.0, %v234_v27  ;;  %vm138_vm2 = vweird.f32 %v234_v27 }
   0x9   :  { %204 = vmatmul.msk.bf16.vlgmr.msra.gmra.mxu0 %vm50_vm0, %v29_v4 }
   0xa   :  { %117 = vmatpush.bf16.msra.mxu1 %v225_v7  ;;  %v135_v29 = vsub.f32 1.0, %v134_v28 }
   0xc   :  { %v136_v30 = vmul.f32 %v234_v27, %v135_v29 }
   0xe   :  { %118 = vmatpush.bf16.msra.mxu1 %v224_v8  ;;  %v137_v31 = vadd.f32 %v234_v27, %v136_v30 }
  0x10   :  { %v139_v32 = vsel %vm138_vm2, %v234_v27, %v137_v31 }
  0x86   :  { %v63_v9 = vpop.f32.mrf.mxu0 }
  0x87   :  { %v64_v11 = vadd.f32 %v229_v10, %v63_v9 }
  0x89   :  { %v68_v14 = vmax.f32 %v64_v11, 0.0 }
  0x8e   :  { %v65_v12 = vpop.f32.mrf.mxu0 }
  0x8f   :  { %v66_v13 = vadd.f32 %v229_v10, %v65_v12 }
  0x91   :  { %v69_v15 = vmax.f32 %v66_v13, 0.0 }
  0x93   :  { %v70_v16 = vpack.c.bf16 %v69_v15, %v68_v14 }
  0x95   :  { %221 = vmatmul.msk.bf16.vlgmr.msra.gmra.mxu1 %vm107_vm1, %v70_v16 }
 0x112   :  { %v120_v18 = vpop.f32.mrf.mxu1 }
 0x113   :  { %v121_v19 = vadd.f32 %v230_v17, %v120_v18 }
 0x115   :  { %v125_v20 = vadd.f32 %v121_v19, %v27_v2 }
 0x117   :  { %v127_v21 = vsel %vm50_vm0, %v125_v20, 0.0 }
 0x118   :  { %128 = vadd.xlane.f32.xlu0 %v127_v21 }
 0x11a   :  { %v122_v22 = vpop.f32.mrf.mxu1 }
 0x11b   :  { %v123_v23 = vadd.f32 %v230_v17, %v122_v22 }
 0x11d   :  { %v126_v24 = vadd.f32 %v123_v23, %v28_v3 }
 0x11f   :  { %v130_v25 = vsel %vm50_vm0, %v126_v24, 0.0 }
 0x120   :  { %131 = vadd.xlane.f32.xlu0 %v130_v25 }
 0x18b   :  { %v129_v33 = vpop.xlane.xlu0 %128 }
 0x18c   :  { %v140_v34 = vmul.f32 %v139_v32, %v129_v33 }
 0x18e   :  { %v142_v35 = vsub.f32 %v125_v20, %v140_v34 }
 0x190   :  { %v144_v36 = vmul.f32 %v142_v35, %v142_v35 }
 0x192   :  { %v146_v37 = vsel %vm50_vm0, %v144_v36, 0.0 }
 0x193   :  { %147 = vadd.xlane.f32.xlu1 %v146_v37  ;;  %v132_v38 = vpop.xlane.xlu0 %131 }
 0x194   :  { %v141_v39 = vmul.f32 %v139_v32, %v132_v38 }
 0x196   :  { %v143_v40 = vsub.f32 %v126_v24, %v141_v39 }
 0x198   :  { %v145_v41 = vmul.f32 %v143_v40, %v143_v40 }
 0x19a   :  { %v149_v42 = vsel %vm50_vm0, %v145_v41, 0.0 }
 0x19b   :  { %150 = vadd.xlane.f32.xlu1 %v149_v42 }
 0x206   :  { %v148_v43 = vpop.xlane.xlu1 %147 }
 0x207   :  { %v152_v44 = vmul.f32 %v148_v43, %v139_v32 }
 0x209   :  { %v154_v45 = vadd.f32 1e-05, %v152_v44 }
 0x20b   :  { %235 = vrsqrt.f32 %v154_v45  ;;  %vm162_vm4 = vweird.f32 %v154_v45 }
 0x20e   :  { %v151_v46 = vpop.xlane.xlu1 %150 }
 0x20f   :  { %v153_v47 = vmul.f32 %v151_v46, %v139_v32 }
 0x211   :  { %v236_v48 = vpop.eup %235  ;;  %v155_v49 = vadd.f32 1e-05, %v153_v47 }
 0x212   :  { %v157_v50 = vmul.f32 %v236_v48, %v154_v45  ;;  %vm163_vm3 = vweird.f32 %v236_v48 }
 0x213   :  { %237 = vrsqrt.f32 %v155_v49  ;;  %vm164_vm5 = vmor %vm162_vm4, %vm163_vm3  ;;  %vm172_vm7 = vweird.f32 %v155_v49 }
 0x214   :  { %v158_v51 = vmul.f32 %v236_v48, %v157_v50 }
 0x216   :  { %v159_v52 = vmul.f32 0.5, %v158_v51 }
 0x218   :  { %v160_v53 = vsub.f32 1.5, %v159_v52 }
 0x219   :  { %v238_v54 = vpop.eup %237 }
 0x21a   :  { %v161_v55 = vmul.f32 %v236_v48, %v160_v53  ;;  %v167_v56 = vmul.f32 %v238_v54, %v155_v49  ;;  %vm173_vm6 = vweird.f32 %v238_v54 }
 0x21b   :  { %vm174_vm8 = vmor %vm172_vm7, %vm173_vm6 }
 0x21c   :  { %v165_v58 = vsel %vm164_vm5, %v236_v48, %v161_v55  ;;  %v168_v59 = vmul.f32 %v238_v54, %v167_v56 }
 0x21d   :  { %v176_v61 = vmul.f32 %v165_v58, %v142_v35 }
 0x21e   :  { %v169_v62 = vmul.f32 0.5, %v168_v59 }
 0x21f   :  { %v182_v63 = vmul.f32 %v231_v57, %v176_v61 }
 0x220   :  { %v170_v0 = vsub.f32 1.5, %v169_v62 }
 0x221   :  { %v188_v1 = vadd.f32 %v232_v60, %v182_v63 }
 0x222   :  { %v171_v2 = vmul.f32 %v238_v54, %v170_v0 }
 0x223   :  { %190 = vst.msk [vmem:[%s336_s7] sm:$0xff] %vm50_vm0, %v188_v1 }
 0x224   :  { %v175_v3 = vsel %vm174_vm8, %v238_v54, %v171_v2 }
 0x225   :  { %v177_v4 = vmul.f32 %v175_v3, %v143_v40 }
 0x227   :  { %v183_v5 = vmul.f32 %v231_v57, %v177_v4 }
 0x229   :  { %v189_v6 = vadd.f32 %v232_v60, %v183_v5 }
 0x22b   :  { %191 = vst.msk [vmem:[%s336_s7 + $0x8] sm:$0xff] %vm50_vm0, %v189_v6 }

// kernel: decoder_forward.19
= control target key start
LH: loop header
LB: loop body
LE: loop exit
PB: predicated region body
PF: predicated region fallthrough
CT: control target
= control target key end

     0   :  { %s373_s0 = inlined_call_operand.vmem [shape: f32[16,32], index: 0, kind: input, shape index: {}]   ;;  %s374_s1 = inlined_call_operand.vmem [shape: bf16[32,64], index: 1, kind: input, shape index: {}]   ;;  %s375_s2 = inlined_call_operand.vmem [shape: f32[1,64], index: 2, kind: input, shape index: {}]   ;;  %s376_s3 = inlined_call_operand.vmem [shape: bf16[64,32], index: 3, kind: input, shape index: {}]   ;;  %s377_s4 = inlined_call_operand.vmem [shape: f32[1,32], index: 4, kind: input, shape index: {}]   ;;  %s378_s5 = inlined_call_operand.vmem [shape: f32[1,32], index: 5, kind: input, shape index: {}]   ;;  %s379_s6 = inlined_call_operand.vmem [shape: f32[1,32], index: 6, kind: input, shape index: {}]   ;;  %s380_s7 = inlined_call_operand.hbm [shape: f32[16,32], index: 7, kind: output, shape index: {}]  }
   0x1   :  { %v238_v0 = vld [vmem:[%s374_s1 + $0x8] sm:$0xff]  ;;  %v237_v1 = vld [vmem:[%s374_s1] sm:$0xff] }
   0x2   :  { %v28_v2 = vld [vmem:[%s373_s0] sm:$0xff]  ;;  %v29_v3 = vld [vmem:[%s373_s0 + $0x8] sm:$0xff]  ;;  %61 = vmatpush.bf16.msra.mxu0 %v238_v0 }
   0x3   :  { %12 = vsyncpa [#allocation3], 0  ;;  %v30_v4 = vpack.c.bf16 %v29_v3, %v28_v2  ;;  %vm51_vm0 = vcmask 261120   ;;  %v242_v5 = vld [vmem:[%s376_s3 + $0x18] sm:$0xff]  ;;  %v241_v6 = vld [vmem:[%s376_s3 + $0x10] sm:$0xff]  ;;  %vm108_vm1 = vcmask 523264  }
   0x4   :  { %116 = vmatpush.bf16.msra.mxu1 %v242_v5  ;;  %v240_v7 = vld [vmem:[%s376_s3 + $0x8] sm:$0xff]  ;;  %v239_v8 = vld [vmem:[%s376_s3] sm:$0xff]  ;;  %v283_v26 = vmov 32.0   ;;  %s199_s23 = sshll.u32 %s380_s7, 4  ;;  %s286_s24 = smov 8   ;;  %s200_s23 = int_to_ptr.hbm [resolvable:$true] %s199_s23 }
   0x5   :  { %v247_v10 = vld [vmem:[%s375_s2] ss:$0 sm:$0xff]  ;;  %251 = vrcp.f32 %v283_v26 }
   0x6   :  { %62 = vmatpush.bf16.msra.mxu0 %v237_v1  ;;  %v248_v17 = vld [vmem:[%s377_s4] ss:$0 sm:$0xff] }
   0x7   :  { %v249_v57 = vld [vmem:[%s378_s5] ss:$0 sm:$0xff]  ;;  %s284_s5 = smov [#allocation2]  }
   0x8   :  { %117 = vmatpush.bf16.msra.mxu1 %v241_v6  ;;  %v250_v61 = vld [vmem:[%s379_s6] ss:$0 sm:$0xff]  ;;  %s197_s20 = sshll.u32 %s284_s5, 4  ;;  %s285_s6 = smov 128   ;;  %s198_s20 = int_to_ptr.vmem [resolvable:$true] %s197_s20 }
   0x9   :  { %219 = vmatmul.msk.bf16.vlgmr.msra.gmra.mxu0 %vm51_vm0, %v30_v4 }
   0xb   :  { %v252_v27 = vpop.eup %251 }
   0xc   :  { %118 = vmatpush.bf16.msra.mxu1 %v240_v7  ;;  %v135_v28 = vmul.f32 32.0, %v252_v27  ;;  %vm139_vm2 = vweird.f32 %v252_v27 }
   0xe   :  { %v136_v29 = vsub.f32 1.0, %v135_v28 }
  0x10   :  { %119 = vmatpush.bf16.msra.mxu1 %v239_v8  ;;  %v137_v30 = vmul.f32 %v252_v27, %v136_v29 }
  0x12   :  { %v138_v31 = vadd.f32 %v252_v27, %v137_v30 }
  0x14   :  { %v140_v32 = vsel %vm139_vm2, %v252_v27, %v138_v31 }
  0x86   :  { %v64_v9 = vpop.f32.mrf.mxu0 }
  0x87   :  { %v65_v11 = vadd.f32 %v247_v10, %v64_v9 }
  0x89   :  { %v69_v14 = vmax.f32 %v65_v11, 0.0 }
  0x8e   :  { %v66_v12 = vpop.f32.mrf.mxu0 }
  0x8f   :  { %v67_v13 = vadd.f32 %v247_v10, %v66_v12 }
  0x91   :  { %v70_v15 = vmax.f32 %v67_v13, 0.0 }
  0x93   :  { %v71_v16 = vpack.c.bf16 %v70_v15, %v69_v14 }
  0x95   :  { %236 = vmatmul.msk.bf16.vlgmr.msra.gmra.mxu1 %vm108_vm1, %v71_v16 }
 0x112   :  { %v121_v18 = vpop.f32.mrf.mxu1 }
 0x113   :  { %v122_v19 = vadd.f32 %v248_v17, %v121_v18 }
 0x115   :  { %v126_v20 = vadd.f32 %v122_v19, %v28_v2 }
 0x117   :  { %v128_v21 = vsel %vm51_vm0, %v126_v20, 0.0 }
 0x118   :  { %129 = vadd.xlane.f32.xlu0 %v128_v21 }
 0x11a   :  { %v123_v22 = vpop.f32.mrf.mxu1 }
 0x11b   :  { %v124_v23 = vadd.f32 %v248_v17, %v123_v22 }
 0x11d   :  { %v127_v24 = vadd.f32 %v124_v23, %v29_v3 }
 0x11f   :  { %v131_v25 = vsel %vm51_vm0, %v127_v24, 0.0 }
 0x120   :  { %132 = vadd.xlane.f32.xlu0 %v131_v25 }
 0x18b   :  { %v130_v33 = vpop.xlane.xlu0 %129 }
 0x18c   :  { %v141_v34 = vmul.f32 %v140_v32, %v130_v33 }
 0x18e   :  { %v143_v35 = vsub.f32 %v126_v20, %v141_v34 }
 0x190   :  { %v145_v36 = vmul.f32 %v143_v35, %v143_v35 }
 0x192   :  { %v147_v37 = vsel %vm51_vm0, %v145_v36, 0.0 }
 0x193   :  { %148 = vadd.xlane.f32.xlu1 %v147_v37  ;;  %v133_v38 = vpop.xlane.xlu0 %132 }
 0x194   :  { %v142_v39 = vmul.f32 %v140_v32, %v133_v38 }
 0x196   :  { %v144_v40 = vsub.f32 %v127_v24, %v142_v39 }
 0x198   :  { %v146_v41 = vmul.f32 %v144_v40, %v144_v40 }
 0x19a   :  { %v150_v42 = vsel %vm51_vm0, %v146_v41, 0.0 }
 0x19b   :  { %151 = vadd.xlane.f32.xlu1 %v150_v42 }
 0x206   :  { %v149_v43 = vpop.xlane.xlu1 %148 }
 0x207   :  { %v153_v44 = vmul.f32 %v149_v43, %v140_v32 }
 0x209   :  { %v155_v45 = vadd.f32 1e-05, %v153_v44 }
 0x20b   :  { %253 = vrsqrt.f32 %v155_v45  ;;  %vm163_vm4 = vweird.f32 %v155_v45 }
 0x20e   :  { %v152_v46 = vpop.xlane.xlu1 %151 }
 0x20f   :  { %v154_v47 = vmul.f32 %v152_v46, %v140_v32 }
 0x211   :  { %v254_v48 = vpop.eup %253  ;;  %v156_v49 = vadd.f32 1e-05, %v154_v47 }
 0x212   :  { %v158_v50 = vmul.f32 %v254_v48, %v155_v45  ;;  %vm164_vm3 = vweird.f32 %v254_v48 }
 0x213   :  { %255 = vrsqrt.f32 %v156_v49  ;;  %vm165_vm5 = vmor %vm163_vm4, %vm164_vm3  ;;  %vm173_vm7 = vweird.f32 %v156_v49 }
 0x214   :  { %v159_v51 = vmul.f32 %v254_v48, %v158_v50 }
 0x216   :  { %v160_v52 = vmul.f32 0.5, %v159_v51 }
 0x218   :  { %v161_v53 = vsub.f32 1.5, %v160_v52 }
 0x219   :  { %v256_v54 = vpop.eup %255 }
 0x21a   :  { %v162_v55 = vmul.f32 %v254_v48, %v161_v53  ;;  %v168_v56 = vmul.f32 %v256_v54, %v156_v49  ;;  %vm174_vm6 = vweird.f32 %v256_v54 }
 0x21b   :  { %vm175_vm8 = vmor %vm173_vm7, %vm174_vm6 }
 0x21c   :  { %v166_v58 = vsel %vm165_vm5, %v254_v48, %v162_v55  ;;  %v169_v59 = vmul.f32 %v256_v54, %v168_v56 }
 0x21d   :  { %v177_v60 = vmul.f32 %v166_v58, %v143_v35 }
 0x21e   :  { %v170_v62 = vmul.f32 0.5, %v169_v59 }
 0x21f   :  { %v183_v63 = vmul.f32 %v249_v57, %v177_v60 }
 0x220   :  { %v171_v0 = vsub.f32 1.5, %v170_v62 }
 0x221   :  { %v189_v1 = vadd.f32 %v250_v61, %v183_v63 }
 0x222   :  { %v172_v2 = vmul.f32 %v256_v54, %v171_v0 }
 0x223   :  { %191 = vst.msk [vmem:[#allocation2] sm:$0xff] %vm51_vm0, %v189_v1 }
 0x224   :  { %v176_v3 = vsel %vm175_vm8, %v256_v54, %v172_v2 }
 0x225   :  { %v178_v4 = vmul.f32 %v176_v3, %v144_v40 }
 0x227   :  { %v184_v5 = vmul.f32 %v249_v57, %v178_v4 }
 0x229   :  { %v190_v6 = vadd.f32 %v250_v61, %v184_v5 }
 0x22b   :  { %192 = vst.msk [vmem:[#allocation2 + $0x8] sm:$0xff] %vm51_vm0, %v190_v6 }
 0x22c   :  { %205 = dma.vmem_to_hbm [thread:$0]  %s198_s20, 256, %s200_s23, [#allocation3], %s285_s6, %s285_s6, %s286_s24  }
 0x22d   :  { %281 = dma.done.wait [#allocation3], 256  }
 0x22e   :  { %282 = vsyncadd [#allocation3], 4294967040 }
 0x22f   :  { %210 = vsyncpa [#allocation3], 1 }

</bundles_post_ra>
